<compile_context>
chip_gen: v6e
topology: v6e:2x2x1
jax: 0.10.0
libtpu: 0.0.40
codegen_flags: <defaults>
</compile_context>

<pallas_src>
import functools
import math

import jax
import jax.numpy as jnp
from jax.experimental import pallas as pl
from jax.experimental.pallas import tpu as pltpu

# ---------------- small ViT config (semantics of ViT-B/16, scaled down) ----
IMG = 32          # image height/width
PATCH = 16        # patch size (same as ViT-B/16)
CIN = 3           # RGB input channels
HIDDEN = 64       # hidden_dim (768 in ViT-B/16)
HEADS = 4         # num_heads (12 in ViT-B/16)
HEAD_DIM = HIDDEN // HEADS
MLP = 128         # mlp_dim (3072 in ViT-B/16)
LAYERS = 2        # encoder layers (12 in ViT-B/16)
OUT = 10          # out_features of the replaced head
BATCH = 2
NPATCH = (IMG // PATCH) * (IMG // PATCH)
SEQ = NPATCH + 1          # +1 for the class token (= 5)
SEQ_PAD = 8               # padded to a sublane multiple; extra keys masked
LN_EPS = 1e-6             # torchvision ViT uses eps=1e-6
NEG_BIG = -1e30           # softmax mask for padded key positions


# ----------------------- in-kernel math helpers -----------------------------
def _layernorm(x, g, b, eps=LN_EPS):
    """x: (M, D) f32; g, b: (1, D)."""
    mean = jnp.mean(x, axis=-1, keepdims=True)
    xc = x - mean
    var = jnp.mean(xc * xc, axis=-1, keepdims=True)
    return xc * jax.lax.rsqrt(var + eps) * g + b


def _erf(x):
    # Abramowitz & Stegun 7.1.26 rational approximation (|err| <= 1.5e-7),
    # built only from Mosaic-supported elementwise ops.
    p = 0.3275911
    a1, a2, a3, a4, a5 = (0.254829592, -0.284496736, 1.421413741,
                          -1.453152027, 1.061405429)
    sgn = jnp.where(x >= 0.0, 1.0, -1.0)
    ax = jnp.abs(x)
    t = 1.0 / (1.0 + p * ax)
    poly = t * (a1 + t * (a2 + t * (a3 + t * (a4 + t * a5))))
    return sgn * (1.0 - poly * jnp.exp(-ax * ax))


def _gelu_exact(x):
    # exact (erf) GELU — matches torchvision MLPBlock's nn.GELU().
    return 0.5 * x * (1.0 + _erf(x * 0.7071067811865475))


# ---------------------------- fused forward kernel --------------------------
def _vit_forward_kernel(patches_ref, pw_ref, pb_ref, cls_ref, pos_ref,
                        ln1g_ref, ln1b_ref, wqkv_ref, bqkv_ref, wo_ref, bo_ref,
                        ln2g_ref, ln2b_ref, w1_ref, b1_ref, w2_ref, b2_ref,
                        fing_ref, finb_ref, hw_ref, hb_ref,
                        o_ref, x_scratch,
                        *, batch, npatch, seq, seq_pad, heads, head_dim):
    layer = pl.program_id(0)
    hdim = heads * head_dim

    # ---- prologue (grid step 0): patch embed + CLS token + pos emb ---------
    @pl.when(layer == 0)
    def _():
        tok = jnp.dot(patches_ref[...].astype(jnp.bfloat16), pw_ref[...],
                      preferred_element_type=jnp.float32) + pb_ref[...]
        pos = pos_ref[...]
        cls_row = cls_ref[...] + pos[0:1, :]                       # (1, H)
        pos_pat = pos[1:seq, :]                                    # (NP, H)
        pad = jnp.zeros((seq_pad - seq, hdim), jnp.float32)
        rows = []
        for b in range(batch):
            rows.append(cls_row)
            rows.append(tok[b * npatch:(b + 1) * npatch, :] + pos_pat)
            rows.append(pad)
        # single full-tile, sublane-aligned store of the whole activation
        x_scratch[...] = jnp.concatenate(rows, axis=0)

    # ---- one encoder layer per grid step (activation stays in VMEM) --------
    x = x_scratch[...]                                             # (B*Sp, H) f32
    y = _layernorm(x, ln1g_ref[0], ln1b_ref[0])
    # fused QKV projection (lane-dense 3*H output); scale folded into Q cols
    qkv = jnp.dot(y.astype(jnp.bfloat16), wqkv_ref[0],
                  preferred_element_type=jnp.float32) + bqkv_ref[0]  # (B*Sp, 3H)

    # key-padding mask: padded key columns -> very negative before softmax
    col = jax.lax.broadcasted_iota(jnp.int32, (seq_pad, seq_pad), 1)
    kmask = jnp.where(col < seq, 0.0, NEG_BIG).astype(jnp.float32)

    ctx_rows = []
    for b in range(batch):
        r0 = b * seq_pad                                # multiple of 8 (aligned)
        qkv_b = qkv[r0:r0 + seq_pad, :]
        q_b = qkv_b[:, 0:hdim].astype(jnp.bfloat16)
        k_b = qkv_b[:, hdim:2 * hdim].astype(jnp.bfloat16)
        v_b = qkv_b[:, 2 * hdim:3 * hdim].astype(jnp.bfloat16)
        heads_out = []
        for h in range(heads):
            c0 = h * head_dim
            q = q_b[:, c0:c0 + head_dim]
            k = k_b[:, c0:c0 + head_dim]
            v = v_b[:, c0:c0 + head_dim]
            # q @ k^T without an explicit transpose (contract on head_dim)
            s = jax.lax.dot_general(
                q, k, (((1,), (1,)), ((), ())),
                preferred_element_type=jnp.float32) + kmask          # (Sp, Sp)
            s = s - jnp.max(s, axis=-1, keepdims=True)
            p = jnp.exp(s)
            p = p * pl.reciprocal(jnp.sum(p, axis=-1, keepdims=True), approx=True)
            heads_out.append(jnp.dot(p.astype(jnp.bfloat16), v,
                                     preferred_element_type=jnp.float32))
        ctx_rows.append(jnp.concatenate(heads_out, axis=-1))         # (Sp, H)
    ctx = jnp.concatenate(ctx_rows, axis=0)                          # (B*Sp, H)

    # output projection + residual 1
    proj = jnp.dot(ctx.astype(jnp.bfloat16), wo_ref[0],
                   preferred_element_type=jnp.float32) + bo_ref[0]
    xres = x + proj

    # LN2 -> MLP (exact GELU) + residual 2
    z = _layernorm(xres, ln2g_ref[0], ln2b_ref[0])
    h1 = jnp.dot(z.astype(jnp.bfloat16), w1_ref[0],
                 preferred_element_type=jnp.float32) + b1_ref[0]
    h1 = _gelu_exact(h1)
    out = xres + jnp.dot(h1.astype(jnp.bfloat16), w2_ref[0],
                         preferred_element_type=jnp.float32) + b2_ref[0]
    x_scratch[...] = out                                             # aligned store

    # ---- epilogue (last grid step): final LN on CLS rows + head ------------
    @pl.when(layer == pl.num_programs(0) - 1)
    def _():
        cls = jnp.concatenate(
            [out[b * seq_pad:b * seq_pad + 1, :] for b in range(batch)],
            axis=0)                                                  # (B, H)
        zc = _layernorm(cls, fing_ref[...], finb_ref[...])
        o_ref[...] = (jnp.dot(zc, hw_ref[...], preferred_element_type=jnp.float32)
                      + hb_ref[...]).astype(o_ref.dtype)


# ---------------------------- BlockSpec helpers ------------------------------
def _rep(*shape):
    """Full-array block, same block every grid step (fetched once)."""
    return pl.BlockSpec(shape, lambda l, _s=shape: (0,) * len(_s))


def _lay(*shape):
    """Per-layer stacked weight: leading layer axis indexed by the grid."""
    return pl.BlockSpec((1,) + shape, lambda l, _s=shape: (l,) + (0,) * len(_s))


# ---------------------------- forward pass ------------------------------------
def vit_forward(params, x):
    """x: (B, C, H, W) NCHW, like the PyTorch module.  Returns (B, OUT)."""
    B, C, H, W = x.shape
    P = PATCH
    nh, nw = H // P, W // P

    # _process_input: Conv2d(C, hidden, k=P, stride=P) as a patch matmul
    # (layout-only XLA glue; all compute happens inside the single kernel).
    patches = (x.reshape(B, C, nh, P, nw, P)
                 .transpose(0, 2, 4, 1, 3, 5)
                 .reshape(B * nh * nw, C * P * P))

    # TODO(synk): nn.Dropout layers are identity at inference and are omitted.
    kernel = functools.partial(
        _vit_forward_kernel,
        batch=B, npatch=nh * nw, seq=SEQ, seq_pad=SEQ_PAD,
        heads=HEADS, head_dim=HEAD_DIM)

    grid_spec = pltpu.PrefetchScalarGridSpec(
        num_scalar_prefetch=0,
        grid=(LAYERS,),
        in_specs=[
            _rep(B * nh * nw, C * P * P),              # patches
            _rep(C * P * P, HIDDEN),                   # patch_w
            _rep(1, HIDDEN),                           # patch_b
            _rep(1, HIDDEN),                           # cls token
            _rep(SEQ_PAD, HIDDEN),                     # pos emb (padded)
            _lay(1, HIDDEN), _lay(1, HIDDEN),          # ln1 gamma/beta
            _lay(HIDDEN, 3 * HIDDEN),                  # wqkv (scale folded in Q)
            _lay(1, 3 * HIDDEN),                       # bqkv
            _lay(HIDDEN, HIDDEN), _lay(1, HIDDEN),     # wo, bo
            _lay(1, HIDDEN), _lay(1, HIDDEN),          # ln2 gamma/beta
            _lay(HIDDEN, MLP), _lay(1, MLP),           # w1, b1
            _lay(MLP, HIDDEN), _lay(1, HIDDEN),        # w2, b2
            _rep(1, HIDDEN), _rep(1, HIDDEN),          # final ln gamma/beta
            _rep(HIDDEN, OUT), _rep(1, OUT),           # head w, b
        ],
        out_specs=pl.BlockSpec((B, OUT), lambda l: (0, 0)),
        scratch_shapes=[pltpu.VMEM((B * SEQ_PAD, HIDDEN), jnp.float32)],
    )

    return pl.pallas_call(
        kernel,
        grid_spec=grid_spec,
        out_shape=jax.ShapeDtypeStruct((B, OUT), jnp.float32),
        compiler_params=pltpu.CompilerParams(
            dimension_semantics=("arbitrary",)),   # sequential over layers
    )(patches, params["patch_w"], params["patch_b"], params["cls_token"],
      params["pos_emb"],
      params["ln1_g"], params["ln1_b"], params["wqkv"], params["bqkv"],
      params["wo"], params["bo"], params["ln2_g"], params["ln2_b"],
      params["w1"], params["b1"], params["w2"], params["b2"],
      params["ln_g"], params["ln_b"], params["head_w"], params["head_b"])


# ---------------------------- parameters --------------------------------------
def init_params(key):
    def nrm(k, shape, std=0.02):
        return std * jax.random.normal(k, shape, dtype=jnp.float32)

    ks = iter(jax.random.split(key, 10))
    scale = 1.0 / math.sqrt(HEAD_DIM)

    # positional embedding padded to SEQ_PAD rows (padded rows never used)
    pos = jnp.zeros((SEQ_PAD, HIDDEN), jnp.float32)
    pos = pos.at[:SEQ].set(nrm(next(ks), (SEQ, HIDDEN)))

    # fused in-projection [Wq | Wk | Wv]; fold 1/sqrt(head_dim) into Q columns
    wqkv = nrm(next(ks), (LAYERS, HIDDEN, 3 * HIDDEN))
    wqkv = wqkv.at[:, :, :HIDDEN].multiply(scale)
    # (bqkv Q-part would also be scaled; it is zero here)

    return {
        # conv_proj (hidden, C, P, P) expressed as a (C*P*P, hidden) matmul weight
        "patch_w": nrm(next(ks), (CIN * PATCH * PATCH, HIDDEN)).astype(jnp.bfloat16),
        "patch_b": jnp.zeros((1, HIDDEN), jnp.float32),
        "cls_token": jnp.zeros((1, HIDDEN), jnp.float32),
        "pos_emb": pos,
        "ln1_g": jnp.ones((LAYERS, 1, HIDDEN), jnp.float32),
        "ln1_b": jnp.zeros((LAYERS, 1, HIDDEN), jnp.float32),
        "wqkv": wqkv.astype(jnp.bfloat16),
        "bqkv": jnp.zeros((LAYERS, 1, 3 * HIDDEN), jnp.float32),
        "wo": nrm(next(ks), (LAYERS, HIDDEN, HIDDEN)).astype(jnp.bfloat16),
        "bo": jnp.zeros((LAYERS, 1, HIDDEN), jnp.float32),
        "ln2_g": jnp.ones((LAYERS, 1, HIDDEN), jnp.float32),
        "ln2_b": jnp.zeros((LAYERS, 1, HIDDEN), jnp.float32),
        "w1": nrm(next(ks), (LAYERS, HIDDEN, MLP)).astype(jnp.bfloat16),
        "b1": jnp.zeros((LAYERS, 1, MLP), jnp.float32),
        "w2": nrm(next(ks), (LAYERS, MLP, HIDDEN)).astype(jnp.bfloat16),
        "b2": jnp.zeros((LAYERS, 1, HIDDEN), jnp.float32),
        "ln_g": jnp.ones((1, HIDDEN), jnp.float32),
        "ln_b": jnp.zeros((1, HIDDEN), jnp.float32),
        "head_w": nrm(next(ks), (HIDDEN, OUT)),     # the replaced heads.head
        "head_b": jnp.zeros((1, OUT), jnp.float32),
    }


# ---------------------------- main ---------------------------------------------
if __name__ == "__main__":
    key = jax.random.PRNGKey(0)
    k_x, k_params = jax.random.split(key)
    x = jax.random.normal(k_x, (BATCH, CIN, IMG, IMG), dtype=jnp.float32)  # NCHW
    params = init_params(k_params)

    fwd = jax.jit(vit_forward)
    out = fwd(params, x)
    jax.block_until_ready(out)

    assert out.shape == (BATCH, OUT), out.shape
    assert out.dtype == jnp.float32
    assert bool(jnp.all(jnp.isfinite(out)))
    print("KERNEL_OK")
</pallas_src>

<mosaic_0001>
module attributes {stable_mosaic.version = 11 : i64} {
  func.func @_vit_forward_kernel(%arg0: i32, %arg1: memref<8x768xf32, #tpu.memory_space<vmem>>, %arg2: memref<768x64xbf16, #tpu.memory_space<vmem>>, %arg3: memref<1x64xf32, #tpu.memory_space<vmem>>, %arg4: memref<1x64xf32, #tpu.memory_space<vmem>>, %arg5: memref<8x64xf32, #tpu.memory_space<vmem>>, %arg6: memref<1x1x64xf32, #tpu.memory_space<vmem>>, %arg7: memref<1x1x64xf32, #tpu.memory_space<vmem>>, %arg8: memref<1x64x192xbf16, #tpu.memory_space<vmem>>, %arg9: memref<1x1x192xf32, #tpu.memory_space<vmem>>, %arg10: memref<1x64x64xbf16, #tpu.memory_space<vmem>>, %arg11: memref<1x1x64xf32, #tpu.memory_space<vmem>>, %arg12: memref<1x1x64xf32, #tpu.memory_space<vmem>>, %arg13: memref<1x1x64xf32, #tpu.memory_space<vmem>>, %arg14: memref<1x64x128xbf16, #tpu.memory_space<vmem>>, %arg15: memref<1x1x128xf32, #tpu.memory_space<vmem>>, %arg16: memref<1x128x64xbf16, #tpu.memory_space<vmem>>, %arg17: memref<1x1x64xf32, #tpu.memory_space<vmem>>, %arg18: memref<1x64xf32, #tpu.memory_space<vmem>>, %arg19: memref<1x64xf32, #tpu.memory_space<vmem>>, %arg20: memref<64x10xf32, #tpu.memory_space<vmem>>, %arg21: memref<1x10xf32, #tpu.memory_space<vmem>>, %arg22: memref<2x10xf32, #tpu.memory_space<vmem>>, %arg23: memref<16x64xf32, #tpu.memory_space<vmem>>) attributes {dimension_semantics = [#tpu.dimension_semantics<arbitrary>], iteration_bounds = array<i64: 2>, scalar_prefetch = 0 : i64, scratch_operands = 1 : i64, tpu.core_type = #tpu.core_type<tc>, window_params = [{pipeline_mode = #tpu.pipeline_mode<synchronous>, transform_indices = @transform_0, window_bounds = array<i64: 8, 768>}, {pipeline_mode = #tpu.pipeline_mode<synchronous>, transform_indices = @transform_1, window_bounds = array<i64: 768, 64>}, {pipeline_mode = #tpu.pipeline_mode<synchronous>, transform_indices = @transform_2, window_bounds = array<i64: 1, 64>}, {pipeline_mode = #tpu.pipeline_mode<synchronous>, transform_indices = @transform_3, window_bounds = array<i64: 1, 64>}, {pipeline_mode = #tpu.pipeline_mode<synchronous>, transform_indices = @transform_4, window_bounds = array<i64: 8, 64>}, {transform_indices = @transform_5, window_bounds = array<i64: 1, 1, 64>}, {transform_indices = @transform_6, window_bounds = array<i64: 1, 1, 64>}, {transform_indices = @transform_7, window_bounds = array<i64: 1, 64, 192>}, {transform_indices = @transform_8, window_bounds = array<i64: 1, 1, 192>}, {transform_indices = @transform_9, window_bounds = array<i64: 1, 64, 64>}, {transform_indices = @transform_10, window_bounds = array<i64: 1, 1, 64>}, {transform_indices = @transform_11, window_bounds = array<i64: 1, 1, 64>}, {transform_indices = @transform_12, window_bounds = array<i64: 1, 1, 64>}, {transform_indices = @transform_13, window_bounds = array<i64: 1, 64, 128>}, {transform_indices = @transform_14, window_bounds = array<i64: 1, 1, 128>}, {transform_indices = @transform_15, window_bounds = array<i64: 1, 128, 64>}, {transform_indices = @transform_16, window_bounds = array<i64: 1, 1, 64>}, {pipeline_mode = #tpu.pipeline_mode<synchronous>, transform_indices = @transform_17, window_bounds = array<i64: 1, 64>}, {pipeline_mode = #tpu.pipeline_mode<synchronous>, transform_indices = @transform_18, window_bounds = array<i64: 1, 64>}, {pipeline_mode = #tpu.pipeline_mode<synchronous>, transform_indices = @transform_19, window_bounds = array<i64: 64, 10>}, {pipeline_mode = #tpu.pipeline_mode<synchronous>, transform_indices = @transform_20, window_bounds = array<i64: 1, 10>}, {pipeline_mode = #tpu.pipeline_mode<synchronous>, transform_indices = @transform_21, window_bounds = array<i64: 2, 10>}]} {
    %c0_i32 = arith.constant 0 : i32
    %0 = arith.cmpi eq, %arg0, %c0_i32 : i32
    %1 = arith.extui %0 : i1 to i32
    %c0_i32_0 = arith.constant 0 : i32
    %2 = arith.cmpi ne, %1, %c0_i32_0 : i32
    scf.if %2 {
      %c0_104 = arith.constant 0 : index
      %c0_105 = arith.constant 0 : index
      %290 = vector.load %arg1[%c0_104, %c0_105] : memref<8x768xf32, #tpu.memory_space<vmem>>, vector<8x768xf32>
      %291 = arith.truncf %290 : vector<8x768xf32> to vector<8x768xbf16>
      %c0_106 = arith.constant 0 : index
      %c0_107 = arith.constant 0 : index
      %292 = vector.load %arg2[%c0_106, %c0_107] : memref<768x64xbf16, #tpu.memory_space<vmem>>, vector<768x64xbf16>
      %cst_108 = arith.constant dense<0.000000e+00> : vector<8x64xf32>
      %293 = tpu.matmul %291, %292, %cst_108 {dimension_numbers = #tpu.dot_dimension_numbers<[1], [0], [0], [1], [0, 0, 1, 1], [], []>} : vector<8x768xbf16>, vector<768x64xbf16>, vector<8x64xf32> -> vector<8x64xf32>
      %c0_109 = arith.constant 0 : index
      %c0_110 = arith.constant 0 : index
      %294 = vector.load %arg3[%c0_109, %c0_110] : memref<1x64xf32, #tpu.memory_space<vmem>>, vector<1x64xf32>
      %295 = vector.broadcast %294 : vector<1x64xf32> to vector<8x64xf32>
      %296 = arith.addf %293, %295 : vector<8x64xf32>
      %c0_111 = arith.constant 0 : index
      %c0_112 = arith.constant 0 : index
      %297 = vector.load %arg5[%c0_111, %c0_112] : memref<8x64xf32, #tpu.memory_space<vmem>>, vector<8x64xf32>
      %c0_113 = arith.constant 0 : index
      %c0_114 = arith.constant 0 : index
      %298 = vector.load %arg4[%c0_113, %c0_114] : memref<1x64xf32, #tpu.memory_space<vmem>>, vector<1x64xf32>
      %299 = vector.extract_strided_slice %297 {offsets = [0, 0], sizes = [1, 64], strides = [1, 1]} : vector<8x64xf32> to vector<1x64xf32>
      %300 = arith.addf %298, %299 : vector<1x64xf32>
      %301 = vector.extract_strided_slice %297 {offsets = [1, 0], sizes = [4, 64], strides = [1, 1]} : vector<8x64xf32> to vector<4x64xf32>
      %cst_115 = arith.constant 0.000000e+00 : f32
      %302 = vector.broadcast %cst_115 : f32 to vector<3x64xf32>
      %303 = vector.extract_strided_slice %296 {offsets = [0, 0], sizes = [4, 64], strides = [1, 1]} : vector<8x64xf32> to vector<4x64xf32>
      %304 = arith.addf %303, %301 : vector<4x64xf32>
      %305 = vector.extract_strided_slice %296 {offsets = [4, 0], sizes = [4, 64], strides = [1, 1]} : vector<8x64xf32> to vector<4x64xf32>
      %306 = arith.addf %305, %301 : vector<4x64xf32>
      %307 = tpu.concatenate %300, %304, %302, %300, %306, %302 in 0 : vector<1x64xf32>, vector<4x64xf32>, vector<3x64xf32>, vector<1x64xf32>, vector<4x64xf32>, vector<3x64xf32> -> vector<16x64xf32>
      %c0_116 = arith.constant 0 : index
      %c0_117 = arith.constant 0 : index
      %308 = vector.load %arg23[%c0_116, %c0_117] : memref<16x64xf32, #tpu.memory_space<vmem>>, vector<16x64xf32>
      tpu.vector_store %arg23[%c0_116, %c0_117], %307 {strides = array<i32>} : memref<16x64xf32, #tpu.memory_space<vmem>>, vector<16x64xf32>,
    } else {
    }
    %c0 = arith.constant 0 : index
    %c0_1 = arith.constant 0 : index
    %3 = vector.load %arg23[%c0, %c0_1] : memref<16x64xf32, #tpu.memory_space<vmem>>, vector<16x64xf32>
    %c0_2 = arith.constant 0 : index
    %c0_3 = arith.constant 0 : index
    %c0_4 = arith.constant 0 : index
    %4 = vector.load %arg6[%c0_2, %c0_3, %c0_4] : memref<1x1x64xf32, #tpu.memory_space<vmem>>, vector<1x1x64xf32>
    %5 = vector.shape_cast %4 : vector<1x1x64xf32> to vector<1x64xf32>
    %c0_5 = arith.constant 0 : index
    %c0_6 = arith.constant 0 : index
    %c0_7 = arith.constant 0 : index
    %6 = vector.load %arg7[%c0_5, %c0_6, %c0_7] : memref<1x1x64xf32, #tpu.memory_space<vmem>>, vector<1x1x64xf32>
    %7 = vector.shape_cast %6 : vector<1x1x64xf32> to vector<1x64xf32>
    %cst = arith.constant dense<0.000000e+00> : vector<16xf32>
    %8 = vector.multi_reduction <add>, %3, %cst [1] : vector<16x64xf32> to vector<16xf32>
    %9 = vector.shape_cast %8 : vector<16xf32> to vector<16x1xf32>
    %cst_8 = arith.constant 6.400000e+01 : f32
    %10 = vector.broadcast %cst_8 : f32 to vector<16x1xf32>
    %11 = arith.divf %9, %10 : vector<16x1xf32>
    %12 = vector.broadcast %11 : vector<16x1xf32> to vector<16x64xf32>
    %13 = arith.subf %3, %12 : vector<16x64xf32>
    %14 = arith.mulf %13, %13 : vector<16x64xf32>
    %cst_9 = arith.constant dense<0.000000e+00> : vector<16xf32>
    %15 = vector.multi_reduction <add>, %14, %cst_9 [1] : vector<16x64xf32> to vector<16xf32>
    %16 = vector.shape_cast %15 : vector<16xf32> to vector<16x1xf32>
    %cst_10 = arith.constant 6.400000e+01 : f32
    %17 = vector.broadcast %cst_10 : f32 to vector<16x1xf32>
    %18 = arith.divf %16, %17 : vector<16x1xf32>
    %cst_11 = arith.constant 9.99999997E-7 : f32
    %19 = vector.broadcast %cst_11 : f32 to vector<16x1xf32>
    %20 = arith.addf %18, %19 : vector<16x1xf32>
    %21 = math.rsqrt %20 : vector<16x1xf32>
    %22 = vector.broadcast %21 : vector<16x1xf32> to vector<16x64xf32>
    %23 = arith.mulf %13, %22 : vector<16x64xf32>
    %24 = vector.broadcast %5 : vector<1x64xf32> to vector<16x64xf32>
    %25 = arith.mulf %23, %24 : vector<16x64xf32>
    %26 = vector.broadcast %7 : vector<1x64xf32> to vector<16x64xf32>
    %27 = arith.addf %25, %26 : vector<16x64xf32>
    %28 = arith.truncf %27 : vector<16x64xf32> to vector<16x64xbf16>
    %c0_12 = arith.constant 0 : index
    %c0_13 = arith.constant 0 : index
    %c0_14 = arith.constant 0 : index
    %29 = vector.load %arg8[%c0_12, %c0_13, %c0_14] : memref<1x64x192xbf16, #tpu.memory_space<vmem>>, vector<1x64x192xbf16>
    %30 = vector.shape_cast %29 : vector<1x64x192xbf16> to vector<64x192xbf16>
    %cst_15 = arith.constant dense<0.000000e+00> : vector<16x192xf32>
    %31 = tpu.matmul %28, %30, %cst_15 {dimension_numbers = #tpu.dot_dimension_numbers<[1], [0], [0], [1], [0, 0, 1, 1], [], []>} : vector<16x64xbf16>, vector<64x192xbf16>, vector<16x192xf32> -> vector<16x192xf32>
    %c0_16 = arith.constant 0 : index
    %c0_17 = arith.constant 0 : index
    %c0_18 = arith.constant 0 : index
    %32 = vector.load %arg9[%c0_16, %c0_17, %c0_18] : memref<1x1x192xf32, #tpu.memory_space<vmem>>, vector<1x1x192xf32>
    %33 = vector.shape_cast %32 : vector<1x1x192xf32> to vector<1x192xf32>
    %34 = vector.broadcast %33 : vector<1x192xf32> to vector<16x192xf32>
    %35 = arith.addf %31, %34 : vector<16x192xf32>
    %36 = tpu.iota {dimensions = array<i32: 1>} : vector<8x8xi32>
    %c5_i32 = arith.constant 5 : i32
    %37 = vector.broadcast %c5_i32 : i32 to vector<8x8xi32>
    %38 = arith.cmpi slt, %36, %37 : vector<8x8xi32>
    %cst_19 = arith.constant 0.000000e+00 : f32
    %cst_20 = arith.constant -1.000000e+30 : f32
    %39 = vector.broadcast %cst_19 : f32 to vector<8x8xf32>
    %40 = vector.broadcast %cst_20 : f32 to vector<8x8xf32>
    %41 = arith.select %38, %39, %40 : vector<8x8xi1>, vector<8x8xf32>
    %42 = vector.extract_strided_slice %35 {offsets = [0, 0], sizes = [8, 192], strides = [1, 1]} : vector<16x192xf32> to vector<8x192xf32>
    %43 = vector.extract_strided_slice %42 {offsets = [0, 0], sizes = [8, 64], strides = [1, 1]} : vector<8x192xf32> to vector<8x64xf32>
    %44 = arith.truncf %43 : vector<8x64xf32> to vector<8x64xbf16>
    %45 = vector.extract_strided_slice %42 {offsets = [0, 64], sizes = [8, 64], strides = [1, 1]} : vector<8x192xf32> to vector<8x64xf32>
    %46 = arith.truncf %45 : vector<8x64xf32> to vector<8x64xbf16>
    %47 = vector.extract_strided_slice %42 {offsets = [0, 128], sizes = [8, 64], strides = [1, 1]} : vector<8x192xf32> to vector<8x64xf32>
    %48 = arith.truncf %47 : vector<8x64xf32> to vector<8x64xbf16>
    %49 = vector.extract_strided_slice %44 {offsets = [0, 0], sizes = [8, 16], strides = [1, 1]} : vector<8x64xbf16> to vector<8x16xbf16>
    %50 = vector.extract_strided_slice %46 {offsets = [0, 0], sizes = [8, 16], strides = [1, 1]} : vector<8x64xbf16> to vector<8x16xbf16>
    %51 = vector.extract_strided_slice %48 {offsets = [0, 0], sizes = [8, 16], strides = [1, 1]} : vector<8x64xbf16> to vector<8x16xbf16>
    %cst_21 = arith.constant dense<0.000000e+00> : vector<8x8xf32>
    %52 = tpu.matmul %49, %50, %cst_21 {dimension_numbers = #tpu.dot_dimension_numbers<[1], [1], [0], [0], [0, 0, 1, 0], [], []>} : vector<8x16xbf16>, vector<8x16xbf16>, vector<8x8xf32> -> vector<8x8xf32>
    %53 = arith.addf %52, %41 : vector<8x8xf32>
    %cst_22 = arith.constant dense<0xFF800000> : vector<8xf32>
    %54 = vector.multi_reduction <maximumf>, %53, %cst_22 [1] : vector<8x8xf32> to vector<8xf32>
    %55 = vector.shape_cast %54 : vector<8xf32> to vector<8x1xf32>
    %56 = vector.broadcast %55 : vector<8x1xf32> to vector<8x8xf32>
    %57 = arith.subf %53, %56 : vector<8x8xf32>
    %58 = math.exp %57 : vector<8x8xf32>
    %cst_23 = arith.constant dense<0.000000e+00> : vector<8xf32>
    %59 = vector.multi_reduction <add>, %58, %cst_23 [1] : vector<8x8xf32> to vector<8xf32>
    %60 = vector.shape_cast %59 : vector<8xf32> to vector<8x1xf32>
    %61 = tpu.reciprocal %60 {approx = true} : vector<8x1xf32> -> vector<8x1xf32>
    %62 = vector.broadcast %61 : vector<8x1xf32> to vector<8x8xf32>
    %63 = arith.mulf %58, %62 : vector<8x8xf32>
    %64 = arith.truncf %63 : vector<8x8xf32> to vector<8x8xbf16>
    %cst_24 = arith.constant dense<0.000000e+00> : vector<8x16xf32>
    %65 = tpu.matmul %64, %51, %cst_24 {dimension_numbers = #tpu.dot_dimension_numbers<[1], [0], [0], [1], [0, 0, 1, 1], [], []>} : vector<8x8xbf16>, vector<8x16xbf16>, vector<8x16xf32> -> vector<8x16xf32>
    %66 = vector.extract_strided_slice %44 {offsets = [0, 16], sizes = [8, 16], strides = [1, 1]} : vector<8x64xbf16> to vector<8x16xbf16>
    %67 = vector.extract_strided_slice %46 {offsets = [0, 16], sizes = [8, 16], strides = [1, 1]} : vector<8x64xbf16> to vector<8x16xbf16>
    %68 = vector.extract_strided_slice %48 {offsets = [0, 16], sizes = [8, 16], strides = [1, 1]} : vector<8x64xbf16> to vector<8x16xbf16>
    %cst_25 = arith.constant dense<0.000000e+00> : vector<8x8xf32>
    %69 = tpu.matmul %66, %67, %cst_25 {dimension_numbers = #tpu.dot_dimension_numbers<[1], [1], [0], [0], [0, 0, 1, 0], [], []>} : vector<8x16xbf16>, vector<8x16xbf16>, vector<8x8xf32> -> vector<8x8xf32>
    %70 = arith.addf %69, %41 : vector<8x8xf32>
    %cst_26 = arith.constant dense<0xFF800000> : vector<8xf32>
    %71 = vector.multi_reduction <maximumf>, %70, %cst_26 [1] : vector<8x8xf32> to vector<8xf32>
    %72 = vector.shape_cast %71 : vector<8xf32> to vector<8x1xf32>
    %73 = vector.broadcast %72 : vector<8x1xf32> to vector<8x8xf32>
    %74 = arith.subf %70, %73 : vector<8x8xf32>
    %75 = math.exp %74 : vector<8x8xf32>
    %cst_27 = arith.constant dense<0.000000e+00> : vector<8xf32>
    %76 = vector.multi_reduction <add>, %75, %cst_27 [1] : vector<8x8xf32> to vector<8xf32>
    %77 = vector.shape_cast %76 : vector<8xf32> to vector<8x1xf32>
    %78 = tpu.reciprocal %77 {approx = true} : vector<8x1xf32> -> vector<8x1xf32>
    %79 = vector.broadcast %78 : vector<8x1xf32> to vector<8x8xf32>
    %80 = arith.mulf %75, %79 : vector<8x8xf32>
    %81 = arith.truncf %80 : vector<8x8xf32> to vector<8x8xbf16>
    %cst_28 = arith.constant dense<0.000000e+00> : vector<8x16xf32>
    %82 = tpu.matmul %81, %68, %cst_28 {dimension_numbers = #tpu.dot_dimension_numbers<[1], [0], [0], [1], [0, 0, 1, 1], [], []>} : vector<8x8xbf16>, vector<8x16xbf16>, vector<8x16xf32> -> vector<8x16xf32>
    %83 = vector.extract_strided_slice %44 {offsets = [0, 32], sizes = [8, 16], strides = [1, 1]} : vector<8x64xbf16> to vector<8x16xbf16>
    %84 = vector.extract_strided_slice %46 {offsets = [0, 32], sizes = [8, 16], strides = [1, 1]} : vector<8x64xbf16> to vector<8x16xbf16>
    %85 = vector.extract_strided_slice %48 {offsets = [0, 32], sizes = [8, 16], strides = [1, 1]} : vector<8x64xbf16> to vector<8x16xbf16>
    %cst_29 = arith.constant dense<0.000000e+00> : vector<8x8xf32>
    %86 = tpu.matmul %83, %84, %cst_29 {dimension_numbers = #tpu.dot_dimension_numbers<[1], [1], [0], [0], [0, 0, 1, 0], [], []>} : vector<8x16xbf16>, vector<8x16xbf16>, vector<8x8xf32> -> vector<8x8xf32>
    %87 = arith.addf %86, %41 : vector<8x8xf32>
    %cst_30 = arith.constant dense<0xFF800000> : vector<8xf32>
    %88 = vector.multi_reduction <maximumf>, %87, %cst_30 [1] : vector<8x8xf32> to vector<8xf32>
    %89 = vector.shape_cast %88 : vector<8xf32> to vector<8x1xf32>
    %90 = vector.broadcast %89 : vector<8x1xf32> to vector<8x8xf32>
    %91 = arith.subf %87, %90 : vector<8x8xf32>
    %92 = math.exp %91 : vector<8x8xf32>
    %cst_31 = arith.constant dense<0.000000e+00> : vector<8xf32>
    %93 = vector.multi_reduction <add>, %92, %cst_31 [1] : vector<8x8xf32> to vector<8xf32>
    %94 = vector.shape_cast %93 : vector<8xf32> to vector<8x1xf32>
    %95 = tpu.reciprocal %94 {approx = true} : vector<8x1xf32> -> vector<8x1xf32>
    %96 = vector.broadcast %95 : vector<8x1xf32> to vector<8x8xf32>
    %97 = arith.mulf %92, %96 : vector<8x8xf32>
    %98 = arith.truncf %97 : vector<8x8xf32> to vector<8x8xbf16>
    %cst_32 = arith.constant dense<0.000000e+00> : vector<8x16xf32>
    %99 = tpu.matmul %98, %85, %cst_32 {dimension_numbers = #tpu.dot_dimension_numbers<[1], [0], [0], [1], [0, 0, 1, 1], [], []>} : vector<8x8xbf16>, vector<8x16xbf16>, vector<8x16xf32> -> vector<8x16xf32>
    %100 = vector.extract_strided_slice %44 {offsets = [0, 48], sizes = [8, 16], strides = [1, 1]} : vector<8x64xbf16> to vector<8x16xbf16>
    %101 = vector.extract_strided_slice %46 {offsets = [0, 48], sizes = [8, 16], strides = [1, 1]} : vector<8x64xbf16> to vector<8x16xbf16>
    %102 = vector.extract_strided_slice %48 {offsets = [0, 48], sizes = [8, 16], strides = [1, 1]} : vector<8x64xbf16> to vector<8x16xbf16>
    %cst_33 = arith.constant dense<0.000000e+00> : vector<8x8xf32>
    %103 = tpu.matmul %100, %101, %cst_33 {dimension_numbers = #tpu.dot_dimension_numbers<[1], [1], [0], [0], [0, 0, 1, 0], [], []>} : vector<8x16xbf16>, vector<8x16xbf16>, vector<8x8xf32> -> vector<8x8xf32>
    %104 = arith.addf %103, %41 : vector<8x8xf32>
    %cst_34 = arith.constant dense<0xFF800000> : vector<8xf32>
    %105 = vector.multi_reduction <maximumf>, %104, %cst_34 [1] : vector<8x8xf32> to vector<8xf32>
    %106 = vector.shape_cast %105 : vector<8xf32> to vector<8x1xf32>
    %107 = vector.broadcast %106 : vector<8x1xf32> to vector<8x8xf32>
    %108 = arith.subf %104, %107 : vector<8x8xf32>
    %109 = math.exp %108 : vector<8x8xf32>
    %cst_35 = arith.constant dense<0.000000e+00> : vector<8xf32>
    %110 = vector.multi_reduction <add>, %109, %cst_35 [1] : vector<8x8xf32> to vector<8xf32>
    %111 = vector.shape_cast %110 : vector<8xf32> to vector<8x1xf32>
    %112 = tpu.reciprocal %111 {approx = true} : vector<8x1xf32> -> vector<8x1xf32>
    %113 = vector.broadcast %112 : vector<8x1xf32> to vector<8x8xf32>
    %114 = arith.mulf %109, %113 : vector<8x8xf32>
    %115 = arith.truncf %114 : vector<8x8xf32> to vector<8x8xbf16>
    %cst_36 = arith.constant dense<0.000000e+00> : vector<8x16xf32>
    %116 = tpu.matmul %115, %102, %cst_36 {dimension_numbers = #tpu.dot_dimension_numbers<[1], [0], [0], [1], [0, 0, 1, 1], [], []>} : vector<8x8xbf16>, vector<8x16xbf16>, vector<8x16xf32> -> vector<8x16xf32>
    %117 = tpu.concatenate %65, %82, %99, %116 in 1 : vector<8x16xf32>, vector<8x16xf32>, vector<8x16xf32>, vector<8x16xf32> -> vector<8x64xf32>
    %118 = vector.extract_strided_slice %35 {offsets = [8, 0], sizes = [8, 192], strides = [1, 1]} : vector<16x192xf32> to vector<8x192xf32>
    %119 = vector.extract_strided_slice %118 {offsets = [0, 0], sizes = [8, 64], strides = [1, 1]} : vector<8x192xf32> to vector<8x64xf32>
    %120 = arith.truncf %119 : vector<8x64xf32> to vector<8x64xbf16>
    %121 = vector.extract_strided_slice %118 {offsets = [0, 64], sizes = [8, 64], strides = [1, 1]} : vector<8x192xf32> to vector<8x64xf32>
    %122 = arith.truncf %121 : vector<8x64xf32> to vector<8x64xbf16>
    %123 = vector.extract_strided_slice %118 {offsets = [0, 128], sizes = [8, 64], strides = [1, 1]} : vector<8x192xf32> to vector<8x64xf32>
    %124 = arith.truncf %123 : vector<8x64xf32> to vector<8x64xbf16>
    %125 = vector.extract_strided_slice %120 {offsets = [0, 0], sizes = [8, 16], strides = [1, 1]} : vector<8x64xbf16> to vector<8x16xbf16>
    %126 = vector.extract_strided_slice %122 {offsets = [0, 0], sizes = [8, 16], strides = [1, 1]} : vector<8x64xbf16> to vector<8x16xbf16>
    %127 = vector.extract_strided_slice %124 {offsets = [0, 0], sizes = [8, 16], strides = [1, 1]} : vector<8x64xbf16> to vector<8x16xbf16>
    %cst_37 = arith.constant dense<0.000000e+00> : vector<8x8xf32>
    %128 = tpu.matmul %125, %126, %cst_37 {dimension_numbers = #tpu.dot_dimension_numbers<[1], [1], [0], [0], [0, 0, 1, 0], [], []>} : vector<8x16xbf16>, vector<8x16xbf16>, vector<8x8xf32> -> vector<8x8xf32>
    %129 = arith.addf %128, %41 : vector<8x8xf32>
    %cst_38 = arith.constant dense<0xFF800000> : vector<8xf32>
    %130 = vector.multi_reduction <maximumf>, %129, %cst_38 [1] : vector<8x8xf32> to vector<8xf32>
    %131 = vector.shape_cast %130 : vector<8xf32> to vector<8x1xf32>
    %132 = vector.broadcast %131 : vector<8x1xf32> to vector<8x8xf32>
    %133 = arith.subf %129, %132 : vector<8x8xf32>
    %134 = math.exp %133 : vector<8x8xf32>
    %cst_39 = arith.constant dense<0.000000e+00> : vector<8xf32>
    %135 = vector.multi_reduction <add>, %134, %cst_39 [1] : vector<8x8xf32> to vector<8xf32>
    %136 = vector.shape_cast %135 : vector<8xf32> to vector<8x1xf32>
    %137 = tpu.reciprocal %136 {approx = true} : vector<8x1xf32> -> vector<8x1xf32>
    %138 = vector.broadcast %137 : vector<8x1xf32> to vector<8x8xf32>
    %139 = arith.mulf %134, %138 : vector<8x8xf32>
    %140 = arith.truncf %139 : vector<8x8xf32> to vector<8x8xbf16>
    %cst_40 = arith.constant dense<0.000000e+00> : vector<8x16xf32>
    %141 = tpu.matmul %140, %127, %cst_40 {dimension_numbers = #tpu.dot_dimension_numbers<[1], [0], [0], [1], [0, 0, 1, 1], [], []>} : vector<8x8xbf16>, vector<8x16xbf16>, vector<8x16xf32> -> vector<8x16xf32>
    %142 = vector.extract_strided_slice %120 {offsets = [0, 16], sizes = [8, 16], strides = [1, 1]} : vector<8x64xbf16> to vector<8x16xbf16>
    %143 = vector.extract_strided_slice %122 {offsets = [0, 16], sizes = [8, 16], strides = [1, 1]} : vector<8x64xbf16> to vector<8x16xbf16>
    %144 = vector.extract_strided_slice %124 {offsets = [0, 16], sizes = [8, 16], strides = [1, 1]} : vector<8x64xbf16> to vector<8x16xbf16>
    %cst_41 = arith.constant dense<0.000000e+00> : vector<8x8xf32>
    %145 = tpu.matmul %142, %143, %cst_41 {dimension_numbers = #tpu.dot_dimension_numbers<[1], [1], [0], [0], [0, 0, 1, 0], [], []>} : vector<8x16xbf16>, vector<8x16xbf16>, vector<8x8xf32> -> vector<8x8xf32>
    %146 = arith.addf %145, %41 : vector<8x8xf32>
    %cst_42 = arith.constant dense<0xFF800000> : vector<8xf32>
    %147 = vector.multi_reduction <maximumf>, %146, %cst_42 [1] : vector<8x8xf32> to vector<8xf32>
    %148 = vector.shape_cast %147 : vector<8xf32> to vector<8x1xf32>
    %149 = vector.broadcast %148 : vector<8x1xf32> to vector<8x8xf32>
    %150 = arith.subf %146, %149 : vector<8x8xf32>
    %151 = math.exp %150 : vector<8x8xf32>
    %cst_43 = arith.constant dense<0.000000e+00> : vector<8xf32>
    %152 = vector.multi_reduction <add>, %151, %cst_43 [1] : vector<8x8xf32> to vector<8xf32>
    %153 = vector.shape_cast %152 : vector<8xf32> to vector<8x1xf32>
    %154 = tpu.reciprocal %153 {approx = true} : vector<8x1xf32> -> vector<8x1xf32>
    %155 = vector.broadcast %154 : vector<8x1xf32> to vector<8x8xf32>
    %156 = arith.mulf %151, %155 : vector<8x8xf32>
    %157 = arith.truncf %156 : vector<8x8xf32> to vector<8x8xbf16>
    %cst_44 = arith.constant dense<0.000000e+00> : vector<8x16xf32>
    %158 = tpu.matmul %157, %144, %cst_44 {dimension_numbers = #tpu.dot_dimension_numbers<[1], [0], [0], [1], [0, 0, 1, 1], [], []>} : vector<8x8xbf16>, vector<8x16xbf16>, vector<8x16xf32> -> vector<8x16xf32>
    %159 = vector.extract_strided_slice %120 {offsets = [0, 32], sizes = [8, 16], strides = [1, 1]} : vector<8x64xbf16> to vector<8x16xbf16>
    %160 = vector.extract_strided_slice %122 {offsets = [0, 32], sizes = [8, 16], strides = [1, 1]} : vector<8x64xbf16> to vector<8x16xbf16>
    %161 = vector.extract_strided_slice %124 {offsets = [0, 32], sizes = [8, 16], strides = [1, 1]} : vector<8x64xbf16> to vector<8x16xbf16>
    %cst_45 = arith.constant dense<0.000000e+00> : vector<8x8xf32>
    %162 = tpu.matmul %159, %160, %cst_45 {dimension_numbers = #tpu.dot_dimension_numbers<[1], [1], [0], [0], [0, 0, 1, 0], [], []>} : vector<8x16xbf16>, vector<8x16xbf16>, vector<8x8xf32> -> vector<8x8xf32>
    %163 = arith.addf %162, %41 : vector<8x8xf32>
    %cst_46 = arith.constant dense<0xFF800000> : vector<8xf32>
    %164 = vector.multi_reduction <maximumf>, %163, %cst_46 [1] : vector<8x8xf32> to vector<8xf32>
    %165 = vector.shape_cast %164 : vector<8xf32> to vector<8x1xf32>
    %166 = vector.broadcast %165 : vector<8x1xf32> to vector<8x8xf32>
    %167 = arith.subf %163, %166 : vector<8x8xf32>
    %168 = math.exp %167 : vector<8x8xf32>
    %cst_47 = arith.constant dense<0.000000e+00> : vector<8xf32>
    %169 = vector.multi_reduction <add>, %168, %cst_47 [1] : vector<8x8xf32> to vector<8xf32>
    %170 = vector.shape_cast %169 : vector<8xf32> to vector<8x1xf32>
    %171 = tpu.reciprocal %170 {approx = true} : vector<8x1xf32> -> vector<8x1xf32>
    %172 = vector.broadcast %171 : vector<8x1xf32> to vector<8x8xf32>
    %173 = arith.mulf %168, %172 : vector<8x8xf32>
    %174 = arith.truncf %173 : vector<8x8xf32> to vector<8x8xbf16>
    %cst_48 = arith.constant dense<0.000000e+00> : vector<8x16xf32>
    %175 = tpu.matmul %174, %161, %cst_48 {dimension_numbers = #tpu.dot_dimension_numbers<[1], [0], [0], [1], [0, 0, 1, 1], [], []>} : vector<8x8xbf16>, vector<8x16xbf16>, vector<8x16xf32> -> vector<8x16xf32>
    %176 = vector.extract_strided_slice %120 {offsets = [0, 48], sizes = [8, 16], strides = [1, 1]} : vector<8x64xbf16> to vector<8x16xbf16>
    %177 = vector.extract_strided_slice %122 {offsets = [0, 48], sizes = [8, 16], strides = [1, 1]} : vector<8x64xbf16> to vector<8x16xbf16>
    %178 = vector.extract_strided_slice %124 {offsets = [0, 48], sizes = [8, 16], strides = [1, 1]} : vector<8x64xbf16> to vector<8x16xbf16>
    %cst_49 = arith.constant dense<0.000000e+00> : vector<8x8xf32>
    %179 = tpu.matmul %176, %177, %cst_49 {dimension_numbers = #tpu.dot_dimension_numbers<[1], [1], [0], [0], [0, 0, 1, 0], [], []>} : vector<8x16xbf16>, vector<8x16xbf16>, vector<8x8xf32> -> vector<8x8xf32>
    %180 = arith.addf %179, %41 : vector<8x8xf32>
    %cst_50 = arith.constant dense<0xFF800000> : vector<8xf32>
    %181 = vector.multi_reduction <maximumf>, %180, %cst_50 [1] : vector<8x8xf32> to vector<8xf32>
    %182 = vector.shape_cast %181 : vector<8xf32> to vector<8x1xf32>
    %183 = vector.broadcast %182 : vector<8x1xf32> to vector<8x8xf32>
    %184 = arith.subf %180, %183 : vector<8x8xf32>
    %185 = math.exp %184 : vector<8x8xf32>
    %cst_51 = arith.constant dense<0.000000e+00> : vector<8xf32>
    %186 = vector.multi_reduction <add>, %185, %cst_51 [1] : vector<8x8xf32> to vector<8xf32>
    %187 = vector.shape_cast %186 : vector<8xf32> to vector<8x1xf32>
    %188 = tpu.reciprocal %187 {approx = true} : vector<8x1xf32> -> vector<8x1xf32>
    %189 = vector.broadcast %188 : vector<8x1xf32> to vector<8x8xf32>
    %190 = arith.mulf %185, %189 : vector<8x8xf32>
    %191 = arith.truncf %190 : vector<8x8xf32> to vector<8x8xbf16>
    %cst_52 = arith.constant dense<0.000000e+00> : vector<8x16xf32>
    %192 = tpu.matmul %191, %178, %cst_52 {dimension_numbers = #tpu.dot_dimension_numbers<[1], [0], [0], [1], [0, 0, 1, 1], [], []>} : vector<8x8xbf16>, vector<8x16xbf16>, vector<8x16xf32> -> vector<8x16xf32>
    %193 = tpu.concatenate %141, %158, %175, %192 in 1 : vector<8x16xf32>, vector<8x16xf32>, vector<8x16xf32>, vector<8x16xf32> -> vector<8x64xf32>
    %194 = tpu.concatenate %117, %193 in 0 : vector<8x64xf32>, vector<8x64xf32> -> vector<16x64xf32>
    %195 = arith.truncf %194 : vector<16x64xf32> to vector<16x64xbf16>
    %c0_53 = arith.constant 0 : index
    %c0_54 = arith.constant 0 : index
    %c0_55 = arith.constant 0 : index
    %196 = vector.load %arg10[%c0_53, %c0_54, %c0_55] : memref<1x64x64xbf16, #tpu.memory_space<vmem>>, vector<1x64x64xbf16>
    %197 = vector.shape_cast %196 : vector<1x64x64xbf16> to vector<64x64xbf16>
    %cst_56 = arith.constant dense<0.000000e+00> : vector<16x64xf32>
    %198 = tpu.matmul %195, %197, %cst_56 {dimension_numbers = #tpu.dot_dimension_numbers<[1], [0], [0], [1], [0, 0, 1, 1], [], []>} : vector<16x64xbf16>, vector<64x64xbf16>, vector<16x64xf32> -> vector<16x64xf32>
    %c0_57 = arith.constant 0 : index
    %c0_58 = arith.constant 0 : index
    %c0_59 = arith.constant 0 : index
    %199 = vector.load %arg11[%c0_57, %c0_58, %c0_59] : memref<1x1x64xf32, #tpu.memory_space<vmem>>, vector<1x1x64xf32>
    %200 = vector.shape_cast %199 : vector<1x1x64xf32> to vector<1x64xf32>
    %201 = vector.broadcast %200 : vector<1x64xf32> to vector<16x64xf32>
    %202 = arith.addf %198, %201 : vector<16x64xf32>
    %203 = arith.addf %3, %202 : vector<16x64xf32>
    %c0_60 = arith.constant 0 : index
    %c0_61 = arith.constant 0 : index
    %c0_62 = arith.constant 0 : index
    %204 = vector.load %arg12[%c0_60, %c0_61, %c0_62] : memref<1x1x64xf32, #tpu.memory_space<vmem>>, vector<1x1x64xf32>
    %205 = vector.shape_cast %204 : vector<1x1x64xf32> to vector<1x64xf32>
    %c0_63 = arith.constant 0 : index
    %c0_64 = arith.constant 0 : index
    %c0_65 = arith.constant 0 : index
    %206 = vector.load %arg13[%c0_63, %c0_64, %c0_65] : memref<1x1x64xf32, #tpu.memory_space<vmem>>, vector<1x1x64xf32>
    %207 = vector.shape_cast %206 : vector<1x1x64xf32> to vector<1x64xf32>
    %cst_66 = arith.constant dense<0.000000e+00> : vector<16xf32>
    %208 = vector.multi_reduction <add>, %203, %cst_66 [1] : vector<16x64xf32> to vector<16xf32>
    %209 = vector.shape_cast %208 : vector<16xf32> to vector<16x1xf32>
    %cst_67 = arith.constant 6.400000e+01 : f32
    %210 = vector.broadcast %cst_67 : f32 to vector<16x1xf32>
    %211 = arith.divf %209, %210 : vector<16x1xf32>
    %212 = vector.broadcast %211 : vector<16x1xf32> to vector<16x64xf32>
    %213 = arith.subf %203, %212 : vector<16x64xf32>
    %214 = arith.mulf %213, %213 : vector<16x64xf32>
    %cst_68 = arith.constant dense<0.000000e+00> : vector<16xf32>
    %215 = vector.multi_reduction <add>, %214, %cst_68 [1] : vector<16x64xf32> to vector<16xf32>
    %216 = vector.shape_cast %215 : vector<16xf32> to vector<16x1xf32>
    %cst_69 = arith.constant 6.400000e+01 : f32
    %217 = vector.broadcast %cst_69 : f32 to vector<16x1xf32>
    %218 = arith.divf %216, %217 : vector<16x1xf32>
    %cst_70 = arith.constant 9.99999997E-7 : f32
    %219 = vector.broadcast %cst_70 : f32 to vector<16x1xf32>
    %220 = arith.addf %218, %219 : vector<16x1xf32>
    %221 = math.rsqrt %220 : vector<16x1xf32>
    %222 = vector.broadcast %221 : vector<16x1xf32> to vector<16x64xf32>
    %223 = arith.mulf %213, %222 : vector<16x64xf32>
    %224 = vector.broadcast %205 : vector<1x64xf32> to vector<16x64xf32>
    %225 = arith.mulf %223, %224 : vector<16x64xf32>
    %226 = vector.broadcast %207 : vector<1x64xf32> to vector<16x64xf32>
    %227 = arith.addf %225, %226 : vector<16x64xf32>
    %228 = arith.truncf %227 : vector<16x64xf32> to vector<16x64xbf16>
    %c0_71 = arith.constant 0 : index
    %c0_72 = arith.constant 0 : index
    %c0_73 = arith.constant 0 : index
    %229 = vector.load %arg14[%c0_71, %c0_72, %c0_73] : memref<1x64x128xbf16, #tpu.memory_space<vmem>>, vector<1x64x128xbf16>
    %230 = vector.shape_cast %229 : vector<1x64x128xbf16> to vector<64x128xbf16>
    %cst_74 = arith.constant dense<0.000000e+00> : vector<16x128xf32>
    %231 = tpu.matmul %228, %230, %cst_74 {dimension_numbers = #tpu.dot_dimension_numbers<[1], [0], [0], [1], [0, 0, 1, 1], [], []>} : vector<16x64xbf16>, vector<64x128xbf16>, vector<16x128xf32> -> vector<16x128xf32>
    %c0_75 = arith.constant 0 : index
    %c0_76 = arith.constant 0 : index
    %c0_77 = arith.constant 0 : index
    %232 = vector.load %arg15[%c0_75, %c0_76, %c0_77] : memref<1x1x128xf32, #tpu.memory_space<vmem>>, vector<1x1x128xf32>
    %233 = vector.shape_cast %232 : vector<1x1x128xf32> to vector<1x128xf32>
    %234 = vector.broadcast %233 : vector<1x128xf32> to vector<16x128xf32>
    %235 = arith.addf %231, %234 : vector<16x128xf32>
    %cst_78 = arith.constant 5.000000e-01 : f32
    %236 = vector.broadcast %cst_78 : f32 to vector<16x128xf32>
    %237 = arith.mulf %236, %235 : vector<16x128xf32>
    %cst_79 = arith.constant 0.707106769 : f32
    %238 = vector.broadcast %cst_79 : f32 to vector<16x128xf32>
    %239 = arith.mulf %235, %238 : vector<16x128xf32>
    %cst_80 = arith.constant 0.000000e+00 : f32
    %240 = vector.broadcast %cst_80 : f32 to vector<16x128xf32>
    %241 = arith.cmpf oge, %239, %240 : vector<16x128xf32>
    %cst_81 = arith.constant 1.000000e+00 : f32
    %cst_82 = arith.constant -1.000000e+00 : f32
    %242 = vector.broadcast %cst_81 : f32 to vector<16x128xf32>
    %243 = vector.broadcast %cst_82 : f32 to vector<16x128xf32>
    %244 = arith.select %241, %242, %243 : vector<16x128xi1>, vector<16x128xf32>
    %245 = math.absf %239 : vector<16x128xf32>
    %cst_83 = arith.constant 0.327591091 : f32
    %246 = vector.broadcast %cst_83 : f32 to vector<16x128xf32>
    %247 = arith.mulf %246, %245 : vector<16x128xf32>
    %cst_84 = arith.constant 1.000000e+00 : f32
    %248 = vector.broadcast %cst_84 : f32 to vector<16x128xf32>
    %249 = arith.addf %248, %247 : vector<16x128xf32>
    %cst_85 = arith.constant 1.000000e+00 : f32
    %250 = vector.broadcast %cst_85 : f32 to vector<16x128xf32>
    %251 = arith.divf %250, %249 : vector<16x128xf32>
    %cst_86 = arith.constant 1.06140542 : f32
    %252 = vector.broadcast %cst_86 : f32 to vector<16x128xf32>
    %253 = arith.mulf %251, %252 : vector<16x128xf32>
    %cst_87 = arith.constant -1.45315206 : f32
    %254 = vector.broadcast %cst_87 : f32 to vector<16x128xf32>
    %255 = arith.addf %254, %253 : vector<16x128xf32>
    %256 = arith.mulf %251, %255 : vector<16x128xf32>
    %cst_88 = arith.constant 1.42141378 : f32
    %257 = vector.broadcast %cst_88 : f32 to vector<16x128xf32>
    %258 = arith.addf %257, %256 : vector<16x128xf32>
    %259 = arith.mulf %251, %258 : vector<16x128xf32>
    %cst_89 = arith.constant -0.284496725 : f32
    %260 = vector.broadcast %cst_89 : f32 to vector<16x128xf32>
    %261 = arith.addf %260, %259 : vector<16x128xf32>
    %262 = arith.mulf %251, %261 : vector<16x128xf32>
    %cst_90 = arith.constant 0.254829586 : f32
    %263 = vector.broadcast %cst_90 : f32 to vector<16x128xf32>
    %264 = arith.addf %263, %262 : vector<16x128xf32>
    %265 = arith.mulf %251, %264 : vector<16x128xf32>
    %cst_91 = arith.constant 0.000000e+00 : f32
    %266 = vector.broadcast %cst_91 : f32 to vector<16x128xf32>
    %267 = arith.subf %266, %245 : vector<16x128xf32>
    %268 = arith.mulf %267, %245 : vector<16x128xf32>
    %269 = math.exp %268 : vector<16x128xf32>
    %270 = arith.mulf %265, %269 : vector<16x128xf32>
    %cst_92 = arith.constant 1.000000e+00 : f32
    %271 = vector.broadcast %cst_92 : f32 to vector<16x128xf32>
    %272 = arith.subf %271, %270 : vector<16x128xf32>
    %273 = arith.mulf %244, %272 : vector<16x128xf32>
    %cst_93 = arith.constant 1.000000e+00 : f32
    %274 = vector.broadcast %cst_93 : f32 to vector<16x128xf32>
    %275 = arith.addf %274, %273 : vector<16x128xf32>
    %276 = arith.mulf %237, %275 : vector<16x128xf32>
    %277 = arith.truncf %276 : vector<16x128xf32> to vector<16x128xbf16>
    %c0_94 = arith.constant 0 : index
    %c0_95 = arith.constant 0 : index
    %c0_96 = arith.constant 0 : index
    %278 = vector.load %arg16[%c0_94, %c0_95, %c0_96] : memref<1x128x64xbf16, #tpu.memory_space<vmem>>, vector<1x128x64xbf16>
    %279 = vector.shape_cast %278 : vector<1x128x64xbf16> to vector<128x64xbf16>
    %cst_97 = arith.constant dense<0.000000e+00> : vector<16x64xf32>
    %280 = tpu.matmul %277, %279, %cst_97 {dimension_numbers = #tpu.dot_dimension_numbers<[1], [0], [0], [1], [0, 0, 1, 1], [], []>} : vector<16x128xbf16>, vector<128x64xbf16>, vector<16x64xf32> -> vector<16x64xf32>
    %281 = arith.addf %203, %280 : vector<16x64xf32>
    %c0_98 = arith.constant 0 : index
    %c0_99 = arith.constant 0 : index
    %c0_100 = arith.constant 0 : index
    %282 = vector.load %arg17[%c0_98, %c0_99, %c0_100] : memref<1x1x64xf32, #tpu.memory_space<vmem>>, vector<1x1x64xf32>
    %283 = vector.shape_cast %282 : vector<1x1x64xf32> to vector<1x64xf32>
    %284 = vector.broadcast %283 : vector<1x64xf32> to vector<16x64xf32>
    %285 = arith.addf %281, %284 : vector<16x64xf32>
    %c0_101 = arith.constant 0 : index
    %c0_102 = arith.constant 0 : index
    %286 = vector.load %arg23[%c0_101, %c0_102] : memref<16x64xf32, #tpu.memory_space<vmem>>, vector<16x64xf32>
    tpu.vector_store %arg23[%c0_101, %c0_102], %285 {strides = array<i32>} : memref<16x64xf32, #tpu.memory_space<vmem>>, vector<16x64xf32>,
    %c1_i32 = arith.constant 1 : i32
    %287 = arith.cmpi eq, %arg0, %c1_i32 : i32
    %288 = arith.extui %287 : i1 to i32
    %c0_i32_103 = arith.constant 0 : i32
    %289 = arith.cmpi ne, %288, %c0_i32_103 : i32
    scf.if %289 {
      %290 = vector.extract_strided_slice %285 {offsets = [0, 0], sizes = [1, 64], strides = [1, 1]} : vector<16x64xf32> to vector<1x64xf32>
      %291 = vector.extract_strided_slice %285 {offsets = [8, 0], sizes = [1, 64], strides = [1, 1]} : vector<16x64xf32> to vector<1x64xf32>
      %292 = tpu.concatenate %290, %291 in 0 : vector<1x64xf32>, vector<1x64xf32> -> vector<2x64xf32>
      %c0_104 = arith.constant 0 : index
      %c0_105 = arith.constant 0 : index
      %293 = vector.load %arg18[%c0_104, %c0_105] : memref<1x64xf32, #tpu.memory_space<vmem>>, vector<1x64xf32>
      %c0_106 = arith.constant 0 : index
      %c0_107 = arith.constant 0 : index
      %294 = vector.load %arg19[%c0_106, %c0_107] : memref<1x64xf32, #tpu.memory_space<vmem>>, vector<1x64xf32>
      %cst_108 = arith.constant dense<0.000000e+00> : vector<2xf32>
      %295 = vector.multi_reduction <add>, %292, %cst_108 [1] : vector<2x64xf32> to vector<2xf32>
      %296 = vector.shape_cast %295 : vector<2xf32> to vector<2x1xf32>
      %cst_109 = arith.constant 6.400000e+01 : f32
      %297 = vector.broadcast %cst_109 : f32 to vector<2x1xf32>
      %298 = arith.divf %296, %297 : vector<2x1xf32>
      %299 = vector.broadcast %298 : vector<2x1xf32> to vector<2x64xf32>
      %300 = arith.subf %292, %299 : vector<2x64xf32>
      %301 = arith.mulf %300, %300 : vector<2x64xf32>
      %cst_110 = arith.constant dense<0.000000e+00> : vector<2xf32>
      %302 = vector.multi_reduction <add>, %301, %cst_110 [1] : vector<2x64xf32> to vector<2xf32>
      %303 = vector.shape_cast %302 : vector<2xf32> to vector<2x1xf32>
      %cst_111 = arith.constant 6.400000e+01 : f32
      %304 = vector.broadcast %cst_111 : f32 to vector<2x1xf32>
      %305 = arith.divf %303, %304 : vector<2x1xf32>
      %cst_112 = arith.constant 9.99999997E-7 : f32
      %306 = vector.broadcast %cst_112 : f32 to vector<2x1xf32>
      %307 = arith.addf %305, %306 : vector<2x1xf32>
      %308 = math.rsqrt %307 : vector<2x1xf32>
      %309 = vector.broadcast %308 : vector<2x1xf32> to vector<2x64xf32>
      %310 = arith.mulf %300, %309 : vector<2x64xf32>
      %311 = vector.broadcast %293 : vector<1x64xf32> to vector<2x64xf32>
      %312 = arith.mulf %310, %311 : vector<2x64xf32>
      %313 = vector.broadcast %294 : vector<1x64xf32> to vector<2x64xf32>
      %314 = arith.addf %312, %313 : vector<2x64xf32>
      %c0_113 = arith.constant 0 : index
      %c0_114 = arith.constant 0 : index
      %315 = vector.load %arg20[%c0_113, %c0_114] : memref<64x10xf32, #tpu.memory_space<vmem>>, vector<64x10xf32>
      %cst_115 = arith.constant dense<0.000000e+00> : vector<2x10xf32>
      %316 = tpu.matmul %314, %315, %cst_115 {dimension_numbers = #tpu.dot_dimension_numbers<[1], [0], [0], [1], [0, 0, 1, 1], [], []>} : vector<2x64xf32>, vector<64x10xf32>, vector<2x10xf32> -> vector<2x10xf32>
      %c0_116 = arith.constant 0 : index
      %c0_117 = arith.constant 0 : index
      %317 = vector.load %arg21[%c0_116, %c0_117] : memref<1x10xf32, #tpu.memory_space<vmem>>, vector<1x10xf32>
      %318 = vector.broadcast %317 : vector<1x10xf32> to vector<2x10xf32>
      %319 = arith.addf %316, %318 : vector<2x10xf32>
      %c0_118 = arith.constant 0 : index
      %c0_119 = arith.constant 0 : index
      %320 = vector.load %arg22[%c0_118, %c0_119] : memref<2x10xf32, #tpu.memory_space<vmem>>, vector<2x10xf32>
      tpu.vector_store %arg22[%c0_118, %c0_119], %319 {strides = array<i32>} : memref<2x10xf32, #tpu.memory_space<vmem>>, vector<2x10xf32>,
    } else {
    }
    return
  }
  func.func @transform_0(%arg0: i32) -> (i32, i32) {
    %c0_i32 = arith.constant 0 : i32
    %c0_i32_0 = arith.constant 0 : i32
    %c0_i32_1 = arith.constant 0 : i32
    return %c0_i32, %c0_i32_0 : i32, i32
  }
  func.func @transform_1(%arg0: i32) -> (i32, i32) {
    %c0_i32 = arith.constant 0 : i32
    %c0_i32_0 = arith.constant 0 : i32
    %c0_i32_1 = arith.constant 0 : i32
    return %c0_i32, %c0_i32_0 : i32, i32
  }
  func.func @transform_2(%arg0: i32) -> (i32, i32) {
    %c0_i32 = arith.constant 0 : i32
    %c0_i32_0 = arith.constant 0 : i32
    %c0_i32_1 = arith.constant 0 : i32
    return %c0_i32, %c0_i32_0 : i32, i32
  }
  func.func @transform_3(%arg0: i32) -> (i32, i32) {
    %c0_i32 = arith.constant 0 : i32
    %c0_i32_0 = arith.constant 0 : i32
    %c0_i32_1 = arith.constant 0 : i32
    return %c0_i32, %c0_i32_0 : i32, i32
  }
  func.func @transform_4(%arg0: i32) -> (i32, i32) {
    %c0_i32 = arith.constant 0 : i32
    %c0_i32_0 = arith.constant 0 : i32
    %c0_i32_1 = arith.constant 0 : i32
    return %c0_i32, %c0_i32_0 : i32, i32
  }
  func.func @transform_5(%arg0: i32) -> (i32, i32, i32) {
    %c0_i32 = arith.constant 0 : i32
    %c0_i32_0 = arith.constant 0 : i32
    %c0_i32_1 = arith.constant 0 : i32
    return %arg0, %c0_i32, %c0_i32_0 : i32, i32, i32
  }
  func.func @transform_6(%arg0: i32) -> (i32, i32, i32) {
    %c0_i32 = arith.constant 0 : i32
    %c0_i32_0 = arith.constant 0 : i32
    %c0_i32_1 = arith.constant 0 : i32
    return %arg0, %c0_i32, %c0_i32_0 : i32, i32, i32
  }
  func.func @transform_7(%arg0: i32) -> (i32, i32, i32) {
    %c0_i32 = arith.constant 0 : i32
    %c0_i32_0 = arith.constant 0 : i32
    %c0_i32_1 = arith.constant 0 : i32
    return %arg0, %c0_i32, %c0_i32_0 : i32, i32, i32
  }
  func.func @transform_8(%arg0: i32) -> (i32, i32, i32) {
    %c0_i32 = arith.constant 0 : i32
    %c0_i32_0 = arith.constant 0 : i32
    %c0_i32_1 = arith.constant 0 : i32
    return %arg0, %c0_i32, %c0_i32_0 : i32, i32, i32
  }
  func.func @transform_9(%arg0: i32) -> (i32, i32, i32) {
    %c0_i32 = arith.constant 0 : i32
    %c0_i32_0 = arith.constant 0 : i32
    %c0_i32_1 = arith.constant 0 : i32
    return %arg0, %c0_i32, %c0_i32_0 : i32, i32, i32
  }
  func.func @transform_10(%arg0: i32) -> (i32, i32, i32) {
    %c0_i32 = arith.constant 0 : i32
    %c0_i32_0 = arith.constant 0 : i32
    %c0_i32_1 = arith.constant 0 : i32
    return %arg0, %c0_i32, %c0_i32_0 : i32, i32, i32
  }
  func.func @transform_11(%arg0: i32) -> (i32, i32, i32) {
    %c0_i32 = arith.constant 0 : i32
    %c0_i32_0 = arith.constant 0 : i32
    %c0_i32_1 = arith.constant 0 : i32
    return %arg0, %c0_i32, %c0_i32_0 : i32, i32, i32
  }
  func.func @transform_12(%arg0: i32) -> (i32, i32, i32) {
    %c0_i32 = arith.constant 0 : i32
    %c0_i32_0 = arith.constant 0 : i32
    %c0_i32_1 = arith.constant 0 : i32
    return %arg0, %c0_i32, %c0_i32_0 : i32, i32, i32
  }
  func.func @transform_13(%arg0: i32) -> (i32, i32, i32) {
    %c0_i32 = arith.constant 0 : i32
    %c0_i32_0 = arith.constant 0 : i32
    %c0_i32_1 = arith.constant 0 : i32
    return %arg0, %c0_i32, %c0_i32_0 : i32, i32, i32
  }
  func.func @transform_14(%arg0: i32) -> (i32, i32, i32) {
    %c0_i32 = arith.constant 0 : i32
    %c0_i32_0 = arith.constant 0 : i32
    %c0_i32_1 = arith.constant 0 : i32
    return %arg0, %c0_i32, %c0_i32_0 : i32, i32, i32
  }
  func.func @transform_15(%arg0: i32) -> (i32, i32, i32) {
    %c0_i32 = arith.constant 0 : i32
    %c0_i32_0 = arith.constant 0 : i32
    %c0_i32_1 = arith.constant 0 : i32
    return %arg0, %c0_i32, %c0_i32_0 : i32, i32, i32
  }
  func.func @transform_16(%arg0: i32) -> (i32, i32, i32) {
    %c0_i32 = arith.constant 0 : i32
    %c0_i32_0 = arith.constant 0 : i32
    %c0_i32_1 = arith.constant 0 : i32
    return %arg0, %c0_i32, %c0_i32_0 : i32, i32, i32
  }
  func.func @transform_17(%arg0: i32) -> (i32, i32) {
    %c0_i32 = arith.constant 0 : i32
    %c0_i32_0 = arith.constant 0 : i32
    %c0_i32_1 = arith.constant 0 : i32
    return %c0_i32, %c0_i32_0 : i32, i32
  }
  func.func @transform_18(%arg0: i32) -> (i32, i32) {
    %c0_i32 = arith.constant 0 : i32
    %c0_i32_0 = arith.constant 0 : i32
    %c0_i32_1 = arith.constant 0 : i32
    return %c0_i32, %c0_i32_0 : i32, i32
  }
  func.func @transform_19(%arg0: i32) -> (i32, i32) {
    %c0_i32 = arith.constant 0 : i32
    %c0_i32_0 = arith.constant 0 : i32
    %c0_i32_1 = arith.constant 0 : i32
    return %c0_i32, %c0_i32_0 : i32, i32
  }
  func.func @transform_20(%arg0: i32) -> (i32, i32) {
    %c0_i32 = arith.constant 0 : i32
    %c0_i32_0 = arith.constant 0 : i32
    %c0_i32_1 = arith.constant 0 : i32
    return %c0_i32, %c0_i32_0 : i32, i32
  }
  func.func @transform_21(%arg0: i32) -> (i32, i32) {
    %c0_i32 = arith.constant 0 : i32
    %c0_i32_0 = arith.constant 0 : i32
    %c0_i32_1 = arith.constant 0 : i32
    return %c0_i32, %c0_i32_0 : i32, i32
  }
}

</mosaic_0001>

<bundles_post_ra>
// kernel: vit_forward.1
= control target key start
LH: loop header
LB: loop body
LE: loop exit
PB: predicated region body
PF: predicated region fallthrough
CT: control target
= control target key end

     0   :  { %s4439_s0 = inlined_call_operand.vmem [shape: f32[8,768], index: 0, kind: input, shape index: {}]   ;;  %s4440_s1 = inlined_call_operand.vmem [shape: bf16[768,64], index: 1, kind: input, shape index: {}]   ;;  %s4441_s2 = inlined_call_operand.vmem [shape: f32[1,64], index: 2, kind: input, shape index: {}]   ;;  %s4442_s3 = inlined_call_operand.vmem [shape: f32[1,64], index: 3, kind: input, shape index: {}]   ;;  %s4443_s4 = inlined_call_operand.vmem [shape: f32[8,64], index: 4, kind: input, shape index: {}]   ;;  %s4444_s5 = inlined_call_operand.vmem [shape: f32[2,1,64], index: 5, kind: input, shape index: {}]   ;;  %s4445_s6 = inlined_call_operand.vmem [shape: f32[2,1,64], index: 6, kind: input, shape index: {}]   ;;  %s4446_s7 = inlined_call_operand.vmem [shape: bf16[2,64,192], index: 7, kind: input, shape index: {}]   ;;  %s4447_s8 = inlined_call_operand.vmem [shape: f32[2,1,192], index: 8, kind: input, shape index: {}]   ;;  %s4448_s9 = inlined_call_operand.vmem [shape: bf16[2,64,64], index: 9, kind: input, shape index: {}]   ;;  %s4449_s10 = inlined_call_operand.vmem [shape: f32[2,1,64], index: 10, kind: input, shape index: {}]   ;;  %s4450_s11 = inlined_call_operand.vmem [shape: f32[2,1,64], index: 11, kind: input, shape index: {}]   ;;  %s4451_s12 = inlined_call_operand.vmem [shape: f32[2,1,64], index: 12, kind: input, shape index: {}]   ;;  %s4452_s13 = inlined_call_operand.vmem [shape: bf16[2,64,128], index: 13, kind: input, shape index: {}]   ;;  %s4453_s14 = inlined_call_operand.vmem [shape: f32[2,1,128], index: 14, kind: input, shape index: {}]   ;;  %s4454_s15 = inlined_call_operand.vmem [shape: bf16[2,128,64], index: 15, kind: input, shape index: {}]   ;;  %s4455_s16 = inlined_call_operand.vmem [shape: f32[2,1,64], index: 16, kind: input, shape index: {}]   ;;  %s4456_s17 = inlined_call_operand.vmem [shape: f32[1,64], index: 17, kind: input, shape index: {}]   ;;  %s4457_s18 = inlined_call_operand.vmem [shape: f32[1,64], index: 18, kind: input, shape index: {}]   ;;  %s4458_s19 = inlined_call_operand.vmem [shape: f32[64,10], index: 19, kind: input, shape index: {}]   ;;  %s4459_s20 = inlined_call_operand.vmem [shape: f32[1,10], index: 20, kind: input, shape index: {}]   ;;  %s4460_s21 = inlined_call_operand.hbm [shape: f32[2,10], index: 21, kind: output, shape index: {}]  }
   0x1   :  { %4464 = sst [smem:[#allocation7_spill]] %s4439_s0 }
   0x2   :  { %4465 = sst [smem:[#allocation8_spill]] %s4440_s1 }
   0x3   :  { %4466 = sst [smem:[#allocation9_spill]] %s4441_s2 }
   0x4   :  { %4467 = sst [smem:[#allocation10_spill]] %s4442_s3 }
   0x5   :  { %4468 = sst [smem:[#allocation11_spill]] %s4443_s4 }
   0x6   :  { %4469 = sst [smem:[#allocation12_spill]] %s4444_s5 }
   0x7   :  { %4470 = sst [smem:[#allocation13_spill]] %s4446_s7 }
   0x8   :  { %4471 = sst [smem:[#allocation14_spill]] %s4447_s8 }
   0x9   :  { %4472 = sst [smem:[#allocation15_spill]] %s4448_s9 }
   0xa   :  { %4473 = sst [smem:[#allocation16_spill]] %s4456_s17 }
   0xb   :  { %4474 = sst [smem:[#allocation17_spill]] %s4457_s18 }
   0xc   :  { %4475 = sst [smem:[#allocation18_spill]] %s4459_s20 }
   0xd   :  { %4476 = sst [smem:[#allocation19_spill]] %s4460_s21 }
   0xe   :  { %26 = vsyncpa [#allocation4], 0  ;;  %s3860_s2 = smov 0  }
   0xf LB: > { %4477 = sst [smem:[#allocation6_spill]] %s3733_s2  ;;  %s3866_s25 = sadd.s32 4294967295, %s3733_s2   ;;  %s3733_s2 = sphi %s3860_s2, %s32_s2  }
  0x10   : > { %p3121_p0 = scmp.ge.s32.totalorder %s3733_s2, 1  ;;  %p678_p1 = scmp.lt.s32.totalorder %s3733_s2, 3 }
  0x12   : > { %p679_p2 = pnand %p3121_p0, %p678_p1 }
  0x13   : > { %p773_p3 = scmp.lt.s32.totalorder (!%p679_p2), %s3866_s25, 1  ;;  %s4479_s7 = sld [smem:[#allocation13_spill]] (!%p679_p2) }
  0x14   : > { %682 = sbr.rel (%p679_p2) target bundleno = 3360 (0xd20), region = 104  ;;  %s4480_s8 = sld [smem:[#allocation14_spill]] (!%p679_p2) }
  0x15   : > { %s4481_s9 = sld [smem:[#allocation15_spill]] (!%p679_p2)  ;;  %p3131_p4 = scmp.ne.s32.totalorder (!%p679_p2), %s3866_s25, 0 }
  0x19   : > { %s3872_s26 = scalar_select %p773_p3, %s3866_s25, 1 }
  0x1a   : > { %s4483_s17 = sld [smem:[#allocation7_spill]] (!%p3131_p4) }
  0x1b   : > { %s3240_s5 = sshll.u32 %s3872_s26, 6  ;;  %s3124_s22 = sshll.u32 %s3872_s26, 1 }
  0x1c   : > { %s3887_s24 = scalar_lea.vmem %s4479_s7, %s3240_s5  ;;  %s3892_s2 = scalar_lea.vmem %s4480_s8, %s3124_s22 }
  0x1d   : > { %s3241_s21 = sshll.u32 %s3872_s26, 5  ;;  %s801_s27 = scalar_lea.vmem %s4451_s12, %s3872_s26 }
  0x1e   : > { %s3902_s4 = scalar_lea.vmem %s4481_s9, %s3241_s21  ;;  %s3915_s8 = scalar_lea.vmem %s4452_s13, %s3241_s21 }
  0x1f   : > { %s809_s28 = scalar_lea.vmem %s4453_s14, %s3872_s26  ;;  %s3924_s9 = scalar_lea.vmem %s4454_s15, %s3240_s5 }
  0x20   : > { %s817_s23 = scalar_lea.vmem %s4455_s16, %s3872_s26  ;;  %822 = sbr.rel (%p3131_p4) target bundleno = 310 (0x136), region = 108 }
  0x21   : > { %s4482_s21 = sld [smem:[#allocation8_spill]] (!%p3131_p4) }
  0x22   : > { %s4484_s20 = sld [smem:[#allocation9_spill]] (!%p3131_p4) }
  0x23   : > { %s4485_s0 = sld [smem:[#allocation11_spill]] (!%p3131_p4) }
  0x24   : > { %s4486_s1 = sld [smem:[#allocation10_spill]] (!%p3131_p4) }
  0x25   : > { %v824_v31 = vld [vmem:[%s4483_s17 + $0x8] sm:$0xff]  ;;  %v823_v34 = vld [vmem:[%s4483_s17] sm:$0xff]  ;;  %v826_v37 = vld [vmem:[%s4483_s17 + $0x18] sm:$0xff]  ;;  %vm1362_vm0 = vcmask 1040384   ;;  %vm1364_vm1 = vcmask 1044480   ;;  %vm1368_vm2 = vcmask 523264  }
  0x26   : > { %v830_v32 = vpack.c.bf16 %v824_v31, %v824_v31  ;;  %v829_v35 = vpack.c.bf16 %v823_v34, %v823_v34  ;;  %v832_v38 = vpack.c.bf16 %v826_v37, %v826_v37  ;;  %v825_v40 = vld [vmem:[%s4483_s17 + $0x10] sm:$0xff]  ;;  %v828_v51 = vld [vmem:[%s4483_s17 + $0x28] sm:$0xff]  ;;  %v827_v58 = vld [vmem:[%s4483_s17 + $0x20] sm:$0xff] }
  0x27   : > { %v3558_v0 = vld [vmem:[%s4482_s21 + $0x78] sm:$0xff]   ;;  %v3562_v4 = vld [vmem:[%s4482_s21 + $0x70] sm:$0xff]   ;;  %v3566_v8 = vld [vmem:[%s4482_s21 + $0x68] sm:$0xff]   ;;  %v831_v41 = vpack.c.bf16 %v825_v40, %v825_v40  ;;  %v834_v52 = vpack.c.bf16 %v828_v51, %v828_v51  ;;  %v833_v59 = vpack.c.bf16 %v827_v58, %v827_v58 }
  0x28   : > { %v3559_v1 = vld [vmem:[%s4482_s21 + $0x38] sm:$0xff]   ;;  %3244 = vmatprep.subr.bf16.mxu0 %v3558_v0  ;;  %v3563_v5 = vld [vmem:[%s4482_s21 + $0x30] sm:$0xff]   ;;  %v3567_v9 = vld [vmem:[%s4482_s21 + $0x28] sm:$0xff]   ;;  %1258 = vmatprep.mubr.bf16.mxu0 %v830_v32 }
  0x29   : > { %v3560_v2 = vld [vmem:[%s4482_s21 + $0xf8] sm:$0xff]   ;;  %3245 = vmatpush3.bf16.msra.mxu0 %v3559_v1  ;;  %v3564_v6 = vld [vmem:[%s4482_s21 + $0xf0] sm:$0xff]   ;;  %v3568_v10 = vld [vmem:[%s4482_s21 + $0xe8] sm:$0xff]   ;;  %1298 = vmatprep.mubr.bf16.mxu1 %v832_v38 }
  0x2a   : > { %v3561_v3 = vld [vmem:[%s4482_s21 + $0xb8] sm:$0xff]   ;;  %3266 = vmatprep.subr.bf16.mxu1 %v3560_v2  ;;  %3246 = vmatprep.subr.bf16.mxu0 %v3562_v4  ;;  %v3565_v7 = vld [vmem:[%s4482_s21 + $0xb0] sm:$0xff]   ;;  %v3569_v11 = vld [vmem:[%s4482_s21 + $0xa8] sm:$0xff]  }
  0x2b   : > { %3267 = vmatpush3.bf16.msra.mxu1 %v3561_v3  ;;  %v3570_v12 = vld [vmem:[%s4482_s21 + $0x60] sm:$0xff]   ;;  %v3574_v16 = vld [vmem:[%s4482_s21 + $0x58] sm:$0xff]   ;;  %v3578_v20 = vld [vmem:[%s4482_s21 + $0x50] sm:$0xff]  }
  0x2c   : > { %3268 = vmatprep.subr.bf16.mxu1 %v3564_v6  ;;  %v3571_v13 = vld [vmem:[%s4482_s21 + $0x20] sm:$0xff]   ;;  %v3575_v17 = vld [vmem:[%s4482_s21 + $0x18] sm:$0xff]   ;;  %v3579_v21 = vld [vmem:[%s4482_s21 + $0x10] sm:$0xff]  }
  0x2d   : > { %3247 = vmatpush3.bf16.msra.mxu0 %v3563_v5  ;;  %v3572_v14 = vld [vmem:[%s4482_s21 + $0xe0] sm:$0xff]   ;;  %v3576_v18 = vld [vmem:[%s4482_s21 + $0xd8] sm:$0xff]   ;;  %v3580_v22 = vld [vmem:[%s4482_s21 + $0xd0] sm:$0xff]  }
  0x2e   : > { %3248 = vmatprep.subr.bf16.mxu0 %v3566_v8  ;;  %v3573_v15 = vld [vmem:[%s4482_s21 + $0xa0] sm:$0xff]   ;;  %v3577_v19 = vld [vmem:[%s4482_s21 + $0x98] sm:$0xff]   ;;  %v3581_v23 = vld [vmem:[%s4482_s21 + $0x90] sm:$0xff]  }
  0x2f   : > { %3269 = vmatpush3.bf16.msra.mxu1 %v3565_v7  ;;  %v3582_v24 = vld [vmem:[%s4482_s21 + $0x48] sm:$0xff]   ;;  %v3586_v28 = vld [vmem:[%s4482_s21 + $0x40] sm:$0xff]   ;;  %v3590_v36 = vld [vmem:[%s4482_s21 + $0x178] sm:$0xff]  }
  0x30   : > { %3270 = vmatprep.subr.bf16.mxu1 %v3568_v10  ;;  %v3583_v25 = vld [vmem:[%s4482_s21 + $0x8] sm:$0xff]   ;;  %v3587_v29 = vld [vmem:[%s4482_s21] sm:$0xff]   ;;  %v3591_v39 = vld [vmem:[%s4482_s21 + $0x138] sm:$0xff]  }
  0x31   : > { %3249 = vmatpush3.bf16.msra.mxu0 %v3567_v9  ;;  %v3584_v26 = vld [vmem:[%s4482_s21 + $0xc8] sm:$0xff]   ;;  %v3588_v30 = vld [vmem:[%s4482_s21 + $0xc0] sm:$0xff]   ;;  %v3592_v42 = vld [vmem:[%s4482_s21 + $0x170] sm:$0xff]  }
  0x32   : > { %3250 = vmatprep.subr.bf16.mxu0 %v3570_v12  ;;  %v3585_v27 = vld [vmem:[%s4482_s21 + $0x88] sm:$0xff]   ;;  %v3589_v33 = vld [vmem:[%s4482_s21 + $0x80] sm:$0xff]   ;;  %v3593_v43 = vld [vmem:[%s4482_s21 + $0x130] sm:$0xff]  }
  0x33   : > { %3271 = vmatpush3.bf16.msra.mxu1 %v3569_v11  ;;  %v3594_v44 = vld [vmem:[%s4482_s21 + $0x168] sm:$0xff]   ;;  %v3596_v46 = vld [vmem:[%s4482_s21 + $0x160] sm:$0xff]   ;;  %v3598_v48 = vld [vmem:[%s4482_s21 + $0x158] sm:$0xff]  }
  0x34   : > { %3272 = vmatprep.subr.bf16.mxu1 %v3572_v14  ;;  %v3595_v45 = vld [vmem:[%s4482_s21 + $0x128] sm:$0xff]   ;;  %v3597_v47 = vld [vmem:[%s4482_s21 + $0x120] sm:$0xff]   ;;  %v3599_v49 = vld [vmem:[%s4482_s21 + $0x118] sm:$0xff]  }
  0x35   : > { %3251 = vmatpush3.bf16.msra.mxu0 %v3571_v13  ;;  %v3600_v50 = vld [vmem:[%s4482_s21 + $0x150] sm:$0xff]   ;;  %v3602_v54 = vld [vmem:[%s4482_s21 + $0x148] sm:$0xff]   ;;  %v3604_v56 = vld [vmem:[%s4482_s21 + $0x140] sm:$0xff]  }
  0x36   : > { %3252 = vmatprep.subr.bf16.mxu0 %v3574_v16  ;;  %v3601_v53 = vld [vmem:[%s4482_s21 + $0x110] sm:$0xff]   ;;  %v3603_v55 = vld [vmem:[%s4482_s21 + $0x108] sm:$0xff]   ;;  %v3605_v57 = vld [vmem:[%s4482_s21 + $0x100] sm:$0xff]  }
  0x37   : > { %3273 = vmatpush3.bf16.msra.mxu1 %v3573_v15  ;;  %v3132_v5 = vld [vmem:[%s4484_s20] ss:$0 sm:$0xff] }
  0x38   : > { %3274 = vmatprep.subr.bf16.mxu1 %v3576_v18  ;;  %v1346_v9 = vld [vmem:[%s4485_s0] sm:$0xff] }
  0x39   : > { %3253 = vmatpush3.bf16.msra.mxu0 %v3575_v17  ;;  %v1350_v13 = vrot.slane %v1346_v9, 1  ;;  %v1353_v14 = vrot.slane %v1346_v9, 5  ;;  %v1347_v15 = vld [vmem:[%s4486_s1] sm:$0x1] }
  0x3a   : > { %3254 = vmatprep.subr.bf16.mxu0 %v3578_v20 }
  0x3b   : > { %3275 = vmatpush3.bf16.msra.mxu1 %v3577_v19  ;;  %v1348_v19 = vadd.f32 %v1347_v15, %v1346_v9 }
  0x3c   : > { %3276 = vmatprep.subr.bf16.mxu1 %v3580_v22 }
  0x3d   : > { %3255 = vmatpush3.bf16.msra.mxu0 %v3579_v21 }
  0x3e   : > { %3256 = vmatprep.subr.bf16.mxu0 %v3582_v24 }
  0x3f   : > { %3277 = vmatpush3.bf16.msra.mxu1 %v3581_v23 }
  0x40   : > { %3278 = vmatprep.subr.bf16.mxu1 %v3584_v26 }
  0x41   : > { %3257 = vmatpush3.bf16.msra.mxu0 %v3583_v25 }
  0x42   : > { %3258 = vmatprep.subr.bf16.mxu0 %v3586_v28 }
  0x43   : > { %3279 = vmatpush3.bf16.msra.mxu1 %v3585_v27 }
  0x44   : > { %3280 = vmatprep.subr.bf16.mxu1 %v3588_v30 }
  0x45   : > { %3259 = vmatpush3.bf16.msra.mxu0 %v3587_v29 }
  0x46   : > { %3288 = vmatprep.subr.bf16.mxu0 %v3590_v36 }
  0x47   : > { %3281 = vmatpush3.bf16.msra.mxu1 %v3589_v33 }
  0x48   : > { %1259 = vmatmul.mubr.bf16.vlgmr.msra.gmra.mxu0 %v829_v35 }
  0x49   : > { %3289 = vmatpush3.bf16.msra.mxu0 %v3591_v39  ;;  %1338 = vmatprep.mubr.bf16.mxu0 %v834_v52 }
  0x4a   : > { %1299 = vmatmul.mubr.bf16.vlgmr.msra.gmra.mxu1 %v831_v41  ;;  %3290 = vmatprep.subr.bf16.mxu0 %v3592_v42 }
  0x4d   : > { %3291 = vmatpush3.bf16.msra.mxu0 %v3593_v43 }
  0x4e   : > { %3292 = vmatprep.subr.bf16.mxu0 %v3594_v44 }
  0x51   : > { %3293 = vmatpush3.bf16.msra.mxu0 %v3595_v45 }
  0x52   : > { %3294 = vmatprep.subr.bf16.mxu0 %v3596_v46 }
  0x55   : > { %3295 = vmatpush3.bf16.msra.mxu0 %v3597_v47 }
  0x56   : > { %3296 = vmatprep.subr.bf16.mxu0 %v3598_v48 }
  0x59   : > { %3297 = vmatpush3.bf16.msra.mxu0 %v3599_v49 }
  0x5a   : > { %3298 = vmatprep.subr.bf16.mxu0 %v3600_v50 }
  0x5d   : > { %3299 = vmatpush3.bf16.msra.mxu0 %v3601_v53 }
  0x5e   : > { %3300 = vmatprep.subr.bf16.mxu0 %v3602_v54 }
  0x61   : > { %3301 = vmatpush3.bf16.msra.mxu0 %v3603_v55 }
  0x62   : > { %3302 = vmatprep.subr.bf16.mxu0 %v3604_v56 }
  0x65   : > { %3303 = vmatpush3.bf16.msra.mxu0 %v3605_v57 }
  0x68   : > { %1339 = vmatmul.mubr.bf16.vlgmr.msra.gmra.mxu0 %v833_v59 }
 0x108   : > { %v3260_v60 = vpop.f32.mrf.mxu0 }
 0x10a   : > { %v3261_v61 = vpop.f32.mrf.mxu0  ;;  %v3282_v62 = vpop.f32.mrf.mxu1 }
 0x10b   : > { %v3262_v4 = vadd.f32 %v3261_v61, %v3260_v60 }
 0x10c   : > { %v3263_v63 = vpop.f32.mrf.mxu0  ;;  %v3283_v0 = vpop.f32.mrf.mxu1 }
 0x10d   : > { %v1261_v6 = vadd.f32 %v3262_v4, %v3132_v5  ;;  %v3284_v7 = vadd.f32 %v3283_v0, %v3282_v62 }
 0x10e   : > { %v3264_v1 = vpop.f32.mrf.mxu0  ;;  %v3285_v2 = vpop.f32.mrf.mxu1 }
 0x10f   : > { %v1301_v11 = vadd.f32 %v3284_v7, %v1261_v6 }
 0x110   : > { %v3286_v3 = vpop.f32.mrf.mxu1 }
 0x128   : > { %v3304_v8 = vpop.f32.mrf.mxu0 }
 0x12a   : > { %v3305_v10 = vpop.f32.mrf.mxu0 }
 0x12b   : > { %v3306_v12 = vadd.f32 %v3305_v10, %v3304_v8 }
 0x12c   : > { %v3307_v16 = vpop.f32.mrf.mxu0 }
 0x12d   : > { %v1341_v17 = vadd.f32 %v3306_v12, %v1301_v11 }
 0x12e   : > { %v3308_v18 = vpop.f32.mrf.mxu0 }
 0x12f   : > { %v1352_v20 = vadd.f32 %v1350_v13, %v1341_v17  ;;  %v1355_v21 = vadd.f32 %v1353_v14, %v1341_v17 }
 0x131   : > { %v1357_v22 = vrot.slane %v1352_v20, 7  ;;  %v1360_v23 = vrot.slane %v1355_v21, 3 }
 0x133   : > { %v1363_v24 = vsel %vm1362_vm0, %v1348_v19, %v1357_v22  ;;  %v1366_v25 = vsel %vm1362_vm0, %v1348_v19, %v1360_v23 }
 0x134   : > { %v1365_v26 = vsel %vm1364_vm1, %v1363_v24, 0.0  ;;  %v1367_v27 = vsel %vm1364_vm1, %v1366_v25, 0.0 }
 0x135   : > { %1369 = vst.msk [vmem:[#allocation2] sm:$0xff] %vm1368_vm2, %v1365_v26  ;;  %1370 = vst.msk [vmem:[#allocation2 + $0x8] sm:$0xff] %vm1368_vm2, %v1367_v27 }
 0x136 PF: > { %vm1375_vm3 = vcmask 523264   ;;  %v3621_v42 = vld [vmem:[%s3887_s24 + $0x34] ss:$8 sps:$4 sm:$0xff]   ;;  %v3623_v43 = vld [vmem:[%s3887_s24 + $0x30] ss:$8 sps:$4 sm:$0xff]   ;;  %v3735_v46 = vmov 0   ;;  %s4489_s29 = scalar_lea.vmem %s4445_s6, %s3872_s26  ;;  %v1430_v4 = vlaneseq }
 0x137   : > { %v3624_v44 = vld [vmem:[%s3887_s24 + $0x24] ss:$8 sps:$4 sm:$0xff]   ;;  %1491 = vmatprep.subr.bf16.mxu1 %v3621_v42  ;;  %v3626_v45 = vld [vmem:[%s3887_s24 + $0x20] ss:$8 sps:$4 sm:$0xff]   ;;  %1515 = vmatprep.mubr.bf16.mxu1 %v3735_v46  ;;  %v3627_v47 = vld [vmem:[%s3887_s24 + $0x14] ss:$8 sps:$4 sm:$0xff]  }
 0x138   : > { %1492 = vmatpush1.bf16.msra.mxu1 %v3623_v43  ;;  %v3629_v48 = vld [vmem:[%s3887_s24 + $0x10] ss:$8 sps:$4 sm:$0xff]   ;;  %v3630_v49 = vld [vmem:[%s3887_s24 + $0x4] ss:$8 sps:$4 sm:$0xff]   ;;  %v3632_v50 = vld [vmem:[%s3887_s24] ss:$8 sps:$4 sm:$0xff]  }
 0x139   : > { %1493 = vmatprep.subr.bf16.mxu1 %v3624_v44  ;;  %s4487_s18 = sld [smem:[#allocation12_spill]]  ;;  %v3182_v63 = vld [vmem:[%s4489_s29] ss:$0 sm:$0xff]  ;;  %v1431_v5 = vshrl.u32 %v1430_v4, 7  ;;  %v3736_v6 = vmov 0.0   ;;  %vm3737_vm4 = vmmov 0  }
 0x13a   : > { %3382 = vmatprep.subr.bf16.mxu0 %v3736_v6  ;;  %v1428_v8 = vld [vmem:[%s3892_s2] sm:$0x3]  ;;  %3384 = vmatprep.mubr.msk.bf16.mxu0 %vm3737_vm4, %v3736_v6  ;;  %s3738_s0 = smov 48   ;;  %s3739_s30 = smov 64   ;;  %vm1535_vm5 = vcmask 130048   ;;  %vm1598_vm6 = vcmask 1043456  }
 0x13b   : > { %v1432_v7 = vsub.s32 0, %v1431_v5  ;;  %s3740_s7 = smov 112   ;;  %s3741_s2 = smov 96   ;;  %v1436_v17 = vsub.s32 1, %v1431_v5  ;;  %v1527_v46 = vand.u32 127, %v1430_v4  ;;  %vm1582_vm8 = vcmask 64512  }
 0x13c   : > { %v4102_v28 = vld [vmem:[#allocation2] sm:$0xff]  ;;  %v4104_v29 = vld [vmem:[#allocation2 + $0x8] sm:$0xff]  ;;  %1494 = vmatpush1.bf16.msra.mxu1 %v3626_v45  ;;  %s3742_s1 = smov 32   ;;  %s3743_s22 = smov 80   ;;  %vm1986_vm9 = vcmask 261120   ;;  %vm1988_vm10 = vcmask 392192  }
 0x13d   : > { %v1376_v30 = vsel %vm1375_vm3, %v4102_v28, 0.0  ;;  %v1379_v31 = vsel %vm1375_vm3, %v4104_v29, 0.0  ;;  %1495 = vmatprep.subr.bf16.mxu1 %v3627_v47  ;;  %v1433_v9 = vrot.slane %v1428_v8, %v1432_v7  ;;  %s3744_s3 = smov 16   ;;  %v4153_v18 = vrot.slane %v1428_v8, %v1436_v17  ;;  %p3231_p5 = scmp.ne.s32.totalorder %s3866_s25, 1 }
 0x13e   : > { %1377 = vadd.xlane.f32.xlu0 %v1376_v30  ;;  %vm1528_vm7 = vcmp.lt.s32.totalorder %v1527_v46, 5  ;;  %v3745_v47 = vmov -1e+30  }
 0x13f   : > { %s4488_s20 = scalar_lea.vmem %s4487_s18, %s3872_s26 }
 0x140   : > { %1496 = vmatpush1.bf16.msra.mxu1 %v3629_v48  ;;  %v3181_v59 = vld [vmem:[%s4488_s20] ss:$0 sm:$0xff]  ;;  %v1529_v48 = vsel %vm1528_vm7, 0.0, %v3745_v47  ;;  %s4490_s20 = scalar_lea.vmem %s4449_s10, %s3872_s26 }
 0x141   : > { %1497 = vmatprep.subr.bf16.mxu1 %v3630_v49 }
 0x142   : > { %1380 = vadd.xlane.f32.xlu0 %v1379_v31 }
 0x144   : > { %1498 = vmatpush1.bf16.msra.mxu1 %v3632_v50 }
 0x145   : > { %3370 = vmatprep.subr.bf16.mxu1 %v3736_v6 }
 0x1c7   : > { %v1378_v32 = vpop.xlane.xlu0 %1377 }
 0x1c8   : > { %v1383_v33 = vmul.f32 0.015625, %v1378_v32 }
 0x1ca   : > { %v1385_v34 = vsub.f32 %v4102_v28, %v1383_v33 }
 0x1cb   : > { %v1381_v35 = vpop.xlane.xlu0 %1380 }
 0x1cc   : > { %v1384_v36 = vmul.f32 0.015625, %v1381_v35  ;;  %v1387_v37 = vmul.f32 %v1385_v34, %v1385_v34 }
 0x1ce   : > { %v1386_v38 = vsub.f32 %v4104_v29, %v1384_v36  ;;  %v1389_v39 = vsel %vm1375_vm3, %v1387_v37, 0.0 }
 0x1cf   : > { %1390 = vadd.xlane.f32.xlu1 %v1389_v39 }
 0x1d0   : > { %v1388_v40 = vmul.f32 %v1386_v38, %v1386_v38 }
 0x1d2   : > { %v1392_v41 = vsel %vm1375_vm3, %v1388_v40, 0.0 }
 0x1d3   : > { %1393 = vadd.xlane.f32.xlu1 %v1392_v41 }
 0x258   : > { %v1391_v51 = vpop.xlane.xlu1 %1390 }
 0x259   : > { %v1395_v52 = vmul.f32 0.015625, %v1391_v51 }
 0x25b   : > { %v1397_v53 = vadd.f32 1e-06, %v1395_v52 }
 0x25c   : > { %v1394_v54 = vpop.xlane.xlu1 %1393 }
 0x25d   : > { %3649 = vrsqrt.f32 %v1397_v53  ;;  %v1396_v55 = vmul.f32 0.015625, %v1394_v54 }
 0x25f   : > { %v1398_v56 = vadd.f32 1e-06, %v1396_v55 }
 0x261   : > { %3651 = vrsqrt.f32 %v1398_v56 }
 0x26a   : > { %v3650_v57 = vpop.eup %3649 }
 0x26b   : > { %v1401_v58 = vmul.f32 %v3650_v57, %v1385_v34 }
 0x26d   : > { %v1409_v62 = vmul.f32 %v3181_v59, %v1401_v58 }
 0x26e   : > { %v3652_v60 = vpop.eup %3651 }
 0x26f   : > { %v1402_v61 = vmul.f32 %v3652_v60, %v1386_v38  ;;  %v1417_v1 = vadd.f32 %v3182_v63, %v1409_v62 }
 0x271   : > { %v1410_v0 = vmul.f32 %v3181_v59, %v1402_v61 }
 0x273   : > { %v1418_v2 = vadd.f32 %v3182_v63, %v1410_v0 }
 0x275   : > { %v1419_v3 = vpack.c.bf16 %v1418_v2, %v1417_v1 }
 0x277   : > { %3191 = vmatmul.mubr.msk.bf16.vlgmr.msra.gmra.mxu1 %vm1375_vm3, %v1419_v3 }
 0x278   : > { %3372 = vmatprep.mubr.msk.bf16.mxu1 %vm3737_vm4, %v3736_v6 }
 0x337   : > { %v1517_v10 = vpop.f32.mrf.mxu1 }
 0x338   : > { %v1518_v11 = vadd.f32 %v1517_v10, %v1433_v9 }
 0x339   : > { %v1519_v13 = vpop.f32.mrf.mxu1 }
 0x33a   : > { %v1530_v12 = vpack.c.bf16 %v1518_v11, %v1518_v11  ;;  %v1520_v21 = vadd.f32 %v1519_v13, %v4153_v18 }
 0x33b   : > { %v1521_v14 = vpop.f32.mrf.mxu1 }
 0x33c   : > { %1644 = vrot.lane.b32.xlu1 %v1530_v12, %s3738_s0  ;;  %1533 = vrot.lane.b32.xlu0 %v1530_v12, %s3739_s30  ;;  %v1522_v15 = vadd.f32 %v1521_v14, %v1433_v9  ;;  %v4160_v25 = vpack.c.bf16 %v1520_v21, %v1520_v21 }
 0x33d   : > { %v4202_v49 = vpop.f32.mrf.mxu1 }
 0x33e   : > { %v1990_v16 = vpack.c.bf16 %v1522_v15, %v1522_v15  ;;  %v1600_v30 = vsel %vm1598_vm6, %v4160_v25, 0 }
 0x340   : > { %1642 = vrot.lane.b32.xlu1 %v1530_v12, %s3740_s7  ;;  %1753 = vrot.lane.b32.xlu0 %v1530_v12, %s3741_s2 }
 0x344   : > { %1755 = vrot.lane.b32.xlu1 %v1530_v12, %s3742_s1  ;;  %1863 = vrot.lane.b32.xlu0 %v1530_v12, %s3743_s22 }
 0x348   : > { %1865 = vrot.lane.b32.xlu1 %v1530_v12, %s3744_s3  ;;  %2101 = vrot.lane.b32.xlu0 %v1990_v16, %s3738_s0 }
 0x34c   : > { %1993 = vrot.lane.b32.xlu1 %v1990_v16, %s3739_s30  ;;  %2212 = vrot.lane.b32.xlu0 %v1990_v16, %s3742_s1 }
 0x350   : > { %2099 = vrot.lane.b32.xlu1 %v1990_v16, %s3740_s7  ;;  %2322 = vrot.lane.b32.xlu0 %v1990_v16, %s3744_s3 }
 0x354   : > { %2210 = vrot.lane.b32.xlu1 %v1990_v16, %s3741_s2 }
 0x358   : > { %2320 = vrot.lane.b32.xlu1 %v1990_v16, %s3743_s22 }
 0x3ae   : > { %v1645_v19 = vpop.permute.xlu1 %1644  ;;  %v1534_v20 = vpop.permute.xlu0 %1533 }
 0x3af   : > { %v1540_v22 = vsel %vm1535_vm5, %v1534_v20, 0  ;;  %v1650_v23 = vsel %vm1535_vm5, %v1645_v19, 0 }
 0x3b0   : > { %3371 = vmatpush3.bf16.xpose.msra.mxu1 %v1540_v22  ;;  %3383 = vmatpush3.bf16.xpose.msra.mxu0 %v1650_v23 }
 0x3b1   : > { %3376 = vmatprep.subr.bf16.mxu1 %v3736_v6  ;;  %3394 = vmatprep.subr.bf16.mxu0 %v3736_v6 }
 0x3b2   : > { %v1643_v24 = vpop.permute.xlu1 %1642  ;;  %v1754_v32 = vpop.permute.xlu0 %1753 }
 0x3b6   : > { %v1756_v26 = vpop.permute.xlu1 %1755  ;;  %v1864_v35 = vpop.permute.xlu0 %1863 }
 0x3b7   : > { %v1761_v27 = vsel %vm1535_vm5, %v1756_v26, 0  ;;  %3373 = vmatmul.mubr.msk.bf16.vlgmr.msra.gmra.mxu1 %vm1535_vm5, %v1530_v12  ;;  %3385 = vmatmul.mubr.msk.bf16.vlgmr.msra.gmra.mxu0 %vm1535_vm5, %v1643_v24 }
 0x3b8   : > { %3377 = vmatpush3.bf16.msra.mxu1 %v1600_v30  ;;  %3395 = vmatpush3.bf16.xpose.msra.mxu0 %v1761_v27 }
 0x3b9   : > { %3396 = vmatprep.mubr.msk.bf16.mxu0 %vm3737_vm4, %v3736_v6  ;;  %3406 = vmatprep.subr.bf16.mxu0 %v3736_v6 }
 0x3ba   : > { %3378 = vmatprep.mubr.msk.bf16.mxu1 %vm3737_vm4, %v3736_v6  ;;  %3388 = vmatprep.subr.bf16.mxu1 %v3736_v6  ;;  %v1866_v31 = vpop.permute.xlu1 %1865  ;;  %v2102_v37 = vpop.permute.xlu0 %2101 }
 0x3bb   : > { %v1871_v33 = vsel %vm1535_vm5, %v1866_v31, 0  ;;  %v2107_v38 = vsel %vm1535_vm5, %v2102_v37, 0 }
 0x3be   : > { %v1994_v34 = vpop.permute.xlu1 %1993  ;;  %v2213_v39 = vpop.permute.xlu0 %2212 }
 0x3bf   : > { %3397 = vmatmul.mubr.msk.bf16.vlgmr.msra.gmra.mxu0 %vm1535_vm5, %v1754_v32  ;;  %v1999_v36 = vsel %vm1535_vm5, %v1994_v34, 0  ;;  %v2218_v41 = vsel %vm1535_vm5, %v2213_v39, 0 }
 0x3c0   : > { %3407 = vmatpush3.bf16.xpose.msra.mxu0 %v1871_v33  ;;  %3408 = vmatprep.mubr.msk.bf16.mxu0 %vm3737_vm4, %v3736_v6 }
 0x3c1   : > { %3418 = vmatprep.subr.bf16.mxu0 %v3736_v6 }
 0x3c2   : > { %v2100_v40 = vpop.permute.xlu1 %2099  ;;  %v2323_v42 = vpop.permute.xlu0 %2322 }
 0x3c3   : > { %v2328_v44 = vsel %vm1535_vm5, %v2323_v42, 0 }
 0x3c6   : > { %v2211_v43 = vpop.permute.xlu1 %2210 }
 0x3c7   : > { %3409 = vmatmul.mubr.msk.bf16.vlgmr.msra.gmra.mxu0 %vm1535_vm5, %v1864_v35 }
 0x3c8   : > { %3419 = vmatpush3.bf16.xpose.msra.mxu0 %v1999_v36  ;;  %3420 = vmatprep.mubr.msk.bf16.mxu0 %vm3737_vm4, %v3736_v6 }
 0x3c9   : > { %3430 = vmatprep.subr.bf16.mxu0 %v3736_v6 }
 0x3ca   : > { %v2321_v45 = vpop.permute.xlu1 %2320 }
 0x3cf   : > { %3421 = vmatmul.mubr.msk.bf16.vlgmr.msra.gmra.mxu0 %vm1535_vm5, %v1990_v16 }
 0x3d0   : > { %3431 = vmatpush3.bf16.xpose.msra.mxu0 %v2107_v38  ;;  %3432 = vmatprep.mubr.msk.bf16.mxu0 %vm3737_vm4, %v3736_v6 }
 0x3d1   : > { %3442 = vmatprep.subr.bf16.mxu0 %v3736_v6 }
 0x3d7   : > { %3433 = vmatmul.mubr.msk.bf16.vlgmr.msra.gmra.mxu0 %vm1535_vm5, %v2100_v40 }
 0x3d8   : > { %3443 = vmatpush3.bf16.xpose.msra.mxu0 %v2218_v41  ;;  %3444 = vmatprep.mubr.msk.bf16.mxu0 %vm3737_vm4, %v3736_v6 }
 0x3d9   : > { %3454 = vmatprep.subr.bf16.mxu0 %v3736_v6 }
 0x3df   : > { %3445 = vmatmul.mubr.msk.bf16.vlgmr.msra.gmra.mxu0 %vm1535_vm5, %v2211_v43 }
 0x3e0   : > { %3455 = vmatpush3.bf16.xpose.msra.mxu0 %v2328_v44  ;;  %3456 = vmatprep.mubr.msk.bf16.mxu0 %vm3737_vm4, %v3736_v6 }
 0x3e1   : > { %3466 = vmatprep.subr.bf16.mxu0 %v3736_v6 }
 0x3e7   : > { %3457 = vmatmul.mubr.msk.bf16.vlgmr.msra.gmra.mxu0 %vm1535_vm5, %v2321_v45 }
 0x3e8   : > { %3474 = vmatprep.mubr.msk.bf16.mxu0 %vm3737_vm4, %v3736_v6 }
 0x477   : > { %v1576_v50 = vpop.f32.mrf.mxu1  ;;  %v1686_v51 = vpop.f32.mrf.mxu0 }
 0x478   : > { %v1577_v52 = vadd.f32 %v1576_v50, %v1529_v48  ;;  %v1687_v53 = vadd.f32 %v1686_v51, %v1529_v48 }
 0x479   : > { %v3374_v54 = vpop.f32.mrf.mxu1  ;;  %v3386_v55 = vpop.f32.mrf.mxu0 }
 0x47a   : > { %v1692_v56 = vsel %vm1582_vm8, %v1687_v53, -inf  ;;  %v1583_v57 = vsel %vm1582_vm8, %v1577_v52, -inf }
 0x47b   : > { %1693 = vmax.xlane.f32.xlu1 %v1692_v56  ;;  %v1689_v58 = vpop.f32.mrf.mxu0  ;;  %1584 = vmax.xlane.f32.xlu0 %v1583_v57  ;;  %v1579_v59 = vpop.f32.mrf.mxu1 }
 0x47d   : > { %v3375_v60 = vpop.f32.mrf.mxu1  ;;  %v3387_v61 = vpop.f32.mrf.mxu0 }
 0x47f   : > { %v1797_v62 = vpop.f32.mrf.mxu0 }
 0x480   : > { %v1798_v63 = vadd.f32 %v1797_v62, %v1529_v48 }
 0x481   : > { %v3398_v0 = vpop.f32.mrf.mxu0 }
 0x482   : > { %v1803_v1 = vsel %vm1582_vm8, %v1798_v63, -inf }
 0x483   : > { %1804 = vmax.xlane.f32.xlu0 %v1803_v1  ;;  %v1800_v2 = vpop.f32.mrf.mxu0  ;;  %v1524_v1 = vadd.f32 %v4202_v49, %v4153_v18 }
 0x485   : > { %v3399_v3 = vpop.f32.mrf.mxu0  ;;  %v4238_v2 = vpack.c.bf16 %v1524_v1, %v1524_v1 }
 0x487   : > { %v1907_v4 = vpop.f32.mrf.mxu0 }
 0x488   : > { %v1908_v5 = vadd.f32 %v1907_v4, %v1529_v48 }
 0x489   : > { %v3410_v7 = vpop.f32.mrf.mxu0 }
 0x48a   : > { %v1913_v8 = vsel %vm1582_vm8, %v1908_v5, -inf }
 0x48b   : > { %1914 = vmax.xlane.f32.xlu0 %v1913_v8  ;;  %v1910_v9 = vpop.f32.mrf.mxu0 }
 0x48d   : > { %v3411_v10 = vpop.f32.mrf.mxu0 }
 0x48f   : > { %v2035_v11 = vpop.f32.mrf.mxu0 }
 0x490   : > { %v2036_v12 = vadd.f32 %v2035_v11, %v1529_v48 }
 0x491   : > { %v3422_v13 = vpop.f32.mrf.mxu0 }
 0x492   : > { %v2041_v14 = vsel %vm1582_vm8, %v2036_v12, -inf }
 0x493   : > { %2042 = vmax.xlane.f32.xlu0 %v2041_v14  ;;  %v2038_v15 = vpop.f32.mrf.mxu0 }
 0x495   : > { %v3423_v16 = vpop.f32.mrf.mxu0 }
 0x497   : > { %v2143_v17 = vpop.f32.mrf.mxu0 }
 0x498   : > { %v4209_v19 = vadd.f32 %v2143_v17, %v1529_v48 }
 0x499   : > { %v3434_v20 = vpop.f32.mrf.mxu0 }
 0x49a   : > { %v2149_v21 = vsel %vm1582_vm8, %v4209_v19, -inf }
 0x49b   : > { %2150 = vmax.xlane.f32.xlu1 %v2149_v21  ;;  %v2146_v22 = vpop.f32.mrf.mxu0 }
 0x49d   : > { %v3435_v23 = vpop.f32.mrf.mxu0 }
 0x49f   : > { %v2254_v24 = vpop.f32.mrf.mxu0 }
 0x4a0   : > { %v2255_v26 = vadd.f32 %v2254_v24, %v1529_v48 }
 0x4a1   : > { %v3446_v27 = vpop.f32.mrf.mxu0 }
 0x4a2   : > { %v2260_v30 = vsel %vm1582_vm8, %v2255_v26, -inf }
 0x4a3   : > { %2261 = vmax.xlane.f32.xlu0 %v2260_v30  ;;  %v2257_v31 = vpop.f32.mrf.mxu0 }
 0x4a5   : > { %v3447_v32 = vpop.f32.mrf.mxu0 }
 0x4a7   : > { %v2364_v33 = vpop.f32.mrf.mxu0 }
 0x4a8   : > { %v2365_v34 = vadd.f32 %v2364_v33, %v1529_v48 }
 0x4a9   : > { %v3458_v35 = vpop.f32.mrf.mxu0 }
 0x4aa   : > { %v2370_v36 = vsel %vm1582_vm8, %v2365_v34, -inf }
 0x4ab   : > { %2371 = vmax.xlane.f32.xlu1 %v2370_v36  ;;  %v2367_v37 = vpop.f32.mrf.mxu0 }
 0x4ad   : > { %v3459_v38 = vpop.f32.mrf.mxu0 }
 0x4b9   : > { %1815 = vrot.lane.b32.xlu0 %v4160_v25, %s3741_s2 }
 0x4bc   : > { %1705 = vrot.lane.b32.xlu1 %v4160_v25, %s3740_s7 }
 0x504   : > { %v1694_v39 = vpop.xlane.xlu1 %1693  ;;  %v1585_v40 = vpop.xlane.xlu0 %1584 }
 0x505   : > { %v1695_v41 = vsub.f32 %v1687_v53, %v1694_v39  ;;  %v1586_v42 = vsub.f32 %v1577_v52, %v1585_v40 }
 0x507   : > { %v1696_v43 = vmul.f32 1.442695, %v1695_v41  ;;  %v1587_v44 = vmul.f32 1.442695, %v1586_v42 }
 0x509   : > { %3653 = vpow2.f32 %v1696_v43 }
 0x50a   : > { %3655 = vpow2.f32 %v1587_v44  ;;  %v2057_v44 = vsel %vm1598_vm6, %v4238_v2, 0 }
 0x50c   : > { %v1805_v45 = vpop.xlane.xlu0 %1804 }
 0x50d   : > { %v1806_v46 = vsub.f32 %v1798_v63, %v1805_v45 }
 0x50f   : > { %v1807_v47 = vmul.f32 1.442695, %v1806_v46 }
 0x511   : > { %3657 = vpow2.f32 %v1807_v47 }
 0x514   : > { %v1915_v48 = vpop.xlane.xlu0 %1914 }
 0x515   : > { %v1916_v50 = vsub.f32 %v1908_v5, %v1915_v48 }
 0x516   : > { %v4219_v51 = vpop.eup %3653 }
 0x517   : > { %v3656_v54 = vpop.eup %3655  ;;  %v1917_v55 = vmul.f32 1.442695, %v1916_v50  ;;  %v1698_v56 = vsel %vm1582_vm8, %v4219_v51, 0.0 }
 0x518   : > { %1699 = vadd.xlane.f32.xlu1 %v1698_v56  ;;  %v1589_v52 = vsel %vm1582_vm8, %v3656_v54, 0.0 }
 0x519   : > { %3659 = vpow2.f32 %v1917_v55  ;;  %1590 = vadd.xlane.f32.xlu0 %v1589_v52 }
 0x51c   : > { %v2043_v53 = vpop.xlane.xlu0 %2042 }
 0x51d   : > { %v2044_v57 = vsub.f32 %v2036_v12, %v2043_v53 }
 0x51e   : > { %v4224_v58 = vpop.eup %3657 }
 0x51f   : > { %v2045_v59 = vmul.f32 1.442695, %v2044_v57  ;;  %v1809_v60 = vsel %vm1582_vm8, %v4224_v58, 0.0 }
 0x520   : > { %1810 = vadd.xlane.f32.xlu0 %v1809_v60 }
 0x521   : > { %3661 = vpow2.f32 %v2045_v59 }
 0x524   : > { %v2151_v7 = vpop.xlane.xlu1 %2150 }
 0x525   : > { %v2152_v8 = vsub.f32 %v4209_v19, %v2151_v7 }
 0x526   : > { %v4228_v61 = vpop.eup %3659 }
 0x527   : > { %v1919_v62 = vsel %vm1582_vm8, %v4228_v61, 0.0  ;;  %v2153_v10 = vmul.f32 1.442695, %v2152_v8 }
 0x528   : > { %1920 = vadd.xlane.f32.xlu1 %v1919_v62 }
 0x52c   : > { %v2262_v3 = vpop.xlane.xlu0 %2261 }
 0x52d   : > { %v2263_v4 = vsub.f32 %v2255_v26, %v2262_v3 }
 0x52e   : > { %v4232_v63 = vpop.eup %3661 }
 0x52f   : > { %v2047_v0 = vsel %vm1582_vm8, %v4232_v63, 0.0  ;;  %v2264_v5 = vmul.f32 1.442695, %v2263_v4 }
 0x530   : > { %2048 = vadd.xlane.f32.xlu0 %v2047_v0  ;;  %v1816_v16 = vpop.permute.xlu0 %1815 }
 0x531   : > { %3663 = vpow2.f32 %v2264_v5  ;;  %v1821_v35 = vsel %vm1598_vm6, %v1816_v16, 0 }
 0x532   : > { %3665 = vpow2.f32 %v2153_v10 }
 0x534   : > { %v2372_v9 = vpop.xlane.xlu1 %2371 }
 0x535   : > { %v2373_v11 = vsub.f32 %v2365_v34, %v2372_v9 }
 0x537   : > { %v2374_v18 = vmul.f32 1.442695, %v2373_v11 }
 0x538   : > { %v1706_v17 = vpop.permute.xlu1 %1705 }
 0x539   : > { %2162 = vrot.lane.b32.xlu1 %v4238_v2, %s3740_s7  ;;  %3667 = vpow2.f32 %v2374_v18  ;;  %v1711_v30 = vsel %vm1598_vm6, %v1706_v17, 0  ;;  %s4493_s7 = sld [smem:[#allocation17_spill]] (!%p3231_p5) }
 0x53e   : > { %v4245_v49 = vpop.eup %3663 }
 0x53f   : > { %v2266_v12 = vsel %vm1582_vm8, %v4245_v49, 0.0  ;;  %v4249_v13 = vpop.eup %3665 }
 0x546   : > { %1925 = vrot.lane.b32.xlu0 %v4160_v25, %s3743_s22  ;;  %v2155_v25 = vsel %vm1582_vm8, %v4249_v13, 0.0  ;;  %v4253_v14 = vpop.eup %3667 }
 0x547   : > { %v2376_v15 = vsel %vm1582_vm8, %v4253_v14, 0.0 }
 0x55d   : > { %2267 = vadd.xlane.f32.xlu1 %v2266_v12 }
 0x565   : > { %2156 = vadd.xlane.f32.xlu0 %v2155_v25 }
 0x569   : > { %2377 = vadd.xlane.f32.xlu0 %v2376_v15 }
 0x56e   : > { %2382 = vrot.lane.b32.xlu1 %v4238_v2, %s3743_s22  ;;  %s4494_s22 = sld [smem:[#allocation18_spill]] (!%p3231_p5) }
 0x57f   : > { %2272 = vrot.lane.b32.xlu0 %v4238_v2, %s3741_s2 }
 0x5a1   : > { %v1700_v20 = vpop.xlane.xlu1 %1699 }
 0x5a2   : > { %v1591_v19 = vpop.xlane.xlu0 %1590 }
 0x5a3   : > { %3669 = vrcp.f32 %v1591_v19 }
 0x5a4   : > { %3671 = vrcp.f32 %v1700_v20 }
 0x5a9   : > { %v1811_v21 = vpop.xlane.xlu0 %1810 }
 0x5aa   : > { %3673 = vrcp.f32 %v1811_v21  ;;  %v3633_v21 = vld [vmem:[%s3902_s4 + $0x18] sm:$0xff]  }
 0x5ab   : > { %3467 = vmatpush3.bf16.msra.mxu0 %v3633_v21 }
 0x5ac   : > { %3468 = vmatprep.subr.bf16.mxu0 %v3736_v6 }
 0x5b0   : > { %v3670_v22 = vpop.eup %3669 }
 0x5b1   : > { %v1593_v23 = vmul.f32 %v3670_v22, %v3656_v54  ;;  %v3672_v26 = vpop.eup %3671  ;;  %v1921_v27 = vpop.xlane.xlu1 %1920 }
 0x5b2   : > { %3675 = vrcp.f32 %v1921_v27  ;;  %v1702_v31 = vmul.f32 %v3672_v26, %v4219_v51  ;;  %v3635_v27 = vld [vmem:[%s3902_s4 + $0x8] sm:$0xff]  }
 0x5b3   : > { %v1594_v24 = vpack.c.bf16 %v1593_v23, %v1593_v23  ;;  %v3634_v23 = vld [vmem:[%s3902_s4 + $0x10] sm:$0xff]  }
 0x5b4   : > { %v1703_v32 = vpack.c.bf16 %v1702_v31, %v1702_v31  ;;  %3469 = vmatpush3.bf16.msra.mxu0 %v3634_v23 }
 0x5b5   : > { %3379 = vmatmul.mubr.msk.bf16.vlgmr.msra.gmra.mxu1 %vm1582_vm8, %v1594_v24  ;;  %v2163_v46 = vpop.permute.xlu1 %2162  ;;  %3470 = vmatprep.subr.bf16.mxu0 %v3736_v6 }
 0x5b6   : > { %3389 = vmatpush3.bf16.msra.mxu1 %v1711_v30  ;;  %3390 = vmatprep.mubr.msk.bf16.mxu1 %vm3737_vm4, %v3736_v6  ;;  %v2168_v48 = vsel %vm1598_vm6, %v2163_v46, 0 }
 0x5b7   : > { %3400 = vmatprep.subr.bf16.mxu1 %v3736_v6  ;;  %v3674_v33 = vpop.eup %3673 }
 0x5b8   : > { %v1813_v36 = vmul.f32 %v3674_v33, %v4224_v58  ;;  %3471 = vmatpush3.bf16.msra.mxu0 %v3635_v27  ;;  %v3636_v33 = vld [vmem:[%s3902_s4] sm:$0xff]  }
 0x5b9   : > { %v2049_v34 = vpop.xlane.xlu0 %2048  ;;  %3472 = vmatprep.subr.bf16.mxu0 %v3736_v6 }
 0x5ba   : > { %3677 = vrcp.f32 %v2049_v34  ;;  %v1814_v38 = vpack.c.bf16 %v1813_v36, %v1813_v36 }
 0x5bc   : > { %3473 = vmatpush3.bf16.msra.mxu0 %v3636_v33  ;;  %v3215_v33 = vld [vmem:[%s801_s27] ss:$0 sm:$0xff] }
 0x5bd   : > { %3391 = vmatmul.mubr.msk.bf16.vlgmr.msra.gmra.mxu1 %vm1582_vm8, %v1703_v32  ;;  %v1926_v37 = vpop.permute.xlu0 %1925  ;;  %3490 = vmatprep.subr.bf16.mxu0 %v3736_v6 }
 0x5be   : > { %3401 = vmatpush3.bf16.msra.mxu1 %v1821_v35  ;;  %3402 = vmatprep.mubr.msk.bf16.mxu1 %vm3737_vm4, %v3736_v6  ;;  %v1931_v40 = vsel %vm1598_vm6, %v1926_v37, 0 }
 0x5bf   : > { %3412 = vmatprep.subr.bf16.mxu1 %v3736_v6  ;;  %v3676_v39 = vpop.eup %3675 }
 0x5c0   : > { %v1923_v41 = vmul.f32 %v3676_v39, %v4228_v61 }
 0x5c2   : > { %v1924_v42 = vpack.c.bf16 %v1923_v41, %v1923_v41 }
 0x5c5   : > { %3403 = vmatmul.mubr.msk.bf16.vlgmr.msra.gmra.mxu1 %vm1582_vm8, %v1814_v38 }
 0x5c6   : > { %3413 = vmatpush3.bf16.msra.mxu1 %v1931_v40  ;;  %3414 = vmatprep.mubr.msk.bf16.mxu1 %vm3737_vm4, %v3736_v6 }
 0x5c7   : > { %3424 = vmatprep.subr.bf16.mxu1 %v3736_v6  ;;  %v3678_v43 = vpop.eup %3677 }
 0x5c8   : > { %v2051_v45 = vmul.f32 %v3678_v43, %v4232_v63 }
 0x5ca   : > { %v2052_v47 = vpack.c.bf16 %v2051_v45, %v2051_v45 }
 0x5cd   : > { %3415 = vmatmul.mubr.msk.bf16.vlgmr.msra.gmra.mxu1 %vm1582_vm8, %v1924_v42 }
 0x5ce   : > { %3425 = vmatpush3.bf16.msra.mxu1 %v2057_v44  ;;  %3426 = vmatprep.mubr.msk.bf16.mxu1 %vm3737_vm4, %v3736_v6 }
 0x5cf   : > { %3436 = vmatprep.subr.bf16.mxu1 %v3736_v6 }
 0x5d5   : > { %3427 = vmatmul.mubr.msk.bf16.vlgmr.msra.gmra.mxu1 %vm1582_vm8, %v2052_v47 }
 0x5d6   : > { %3437 = vmatpush3.bf16.msra.mxu1 %v2168_v48  ;;  %3438 = vmatprep.mubr.msk.bf16.mxu1 %vm3737_vm4, %v3736_v6 }
 0x5d7   : > { %3448 = vmatprep.subr.bf16.mxu1 %v3736_v6 }
 0x5e6   : > { %v2268_v51 = vpop.xlane.xlu1 %2267 }
 0x5ea   : > { %v2383_v60 = vpop.permute.xlu1 %2382 }
 0x5eb   : > { %v2388_v63 = vsel %vm1598_vm6, %v2383_v60, 0  ;;  %v3208_v60 = vld [vmem:[%s4490_s20] ss:$0 sm:$0xff] }
 0x5ee   : > { %v2157_v50 = vpop.xlane.xlu0 %2156 }
 0x5ef   : > { %3679 = vrcp.f32 %v2157_v50 }
 0x5f0   : > { %3681 = vrcp.f32 %v2268_v51 }
 0x5f2   : > { %v2378_v54 = vpop.xlane.xlu0 %2377 }
 0x5f3   : > { %3683 = vrcp.f32 %v2378_v54 }
 0x5f6   : > { %v2273_v52 = vpop.permute.xlu0 %2272 }
 0x5f7   : > { %v2278_v58 = vsel %vm1598_vm6, %v2273_v52, 0 }
 0x5fc   : > { %v3680_v55 = vpop.eup %3679 }
 0x5fd   : > { %v2159_v56 = vmul.f32 %v3680_v55, %v4249_v13  ;;  %v3682_v57 = vpop.eup %3681 }
 0x5fe   : > { %v2270_v59 = vmul.f32 %v3682_v57, %v4245_v49 }
 0x5ff   : > { %v2160_v53 = vpack.c.bf16 %v2159_v56, %v2159_v56 }
 0x600   : > { %v2271_v61 = vpack.c.bf16 %v2270_v59, %v2270_v59  ;;  %v3684_v62 = vpop.eup %3683 }
 0x601   : > { %3439 = vmatmul.mubr.msk.bf16.vlgmr.msra.gmra.mxu1 %vm1582_vm8, %v2160_v53  ;;  %v2380_v0 = vmul.f32 %v3684_v62, %v4253_v14 }
 0x602   : > { %3449 = vmatpush3.bf16.msra.mxu1 %v2278_v58  ;;  %3450 = vmatprep.mubr.msk.bf16.mxu1 %vm3737_vm4, %v3736_v6 }
 0x603   : > { %3460 = vmatprep.subr.bf16.mxu1 %v3736_v6  ;;  %v2381_v1 = vpack.c.bf16 %v2380_v0, %v2380_v0 }
 0x609   : > { %3451 = vmatmul.mubr.msk.bf16.vlgmr.msra.gmra.mxu1 %vm1582_vm8, %v2271_v61 }
 0x60a   : > { %3461 = vmatpush3.bf16.msra.mxu1 %v2388_v63  ;;  %3462 = vmatprep.mubr.msk.bf16.mxu1 %vm3737_vm4, %v3736_v6 }
 0x60b   : > { %3478 = vmatprep.subr.bf16.mxu1 %v3736_v6 }
 0x611   : > { %3463 = vmatmul.mubr.msk.bf16.vlgmr.msra.gmra.mxu1 %vm1582_vm8, %v2381_v1 }
 0x612   : > { %3486 = vmatprep.mubr.msk.bf16.mxu1 %vm3737_vm4, %v3736_v6 }
 0x675   : > { %v1636_v2 = vpop.f32.mrf.mxu1 }
 0x677   : > { %v3380_v3 = vpop.f32.mrf.mxu1 }
 0x679   : > { %v1639_v4 = vpop.f32.mrf.mxu1 }
 0x67b   : > { %v3381_v5 = vpop.f32.mrf.mxu1 }
 0x67d   : > { %v1747_v7 = vpop.f32.mrf.mxu1 }
 0x67f   : > { %v3392_v8 = vpop.f32.mrf.mxu1 }
 0x681   : > { %v1750_v9 = vpop.f32.mrf.mxu1 }
 0x683   : > { %v3393_v10 = vpop.f32.mrf.mxu1 }
 0x685   : > { %v1857_v11 = vpop.f32.mrf.mxu1 }
 0x687   : > { %v3404_v18 = vpop.f32.mrf.mxu1 }
 0x689   : > { %v1860_v49 = vpop.f32.mrf.mxu1 }
 0x68b   : > { %v3405_v12 = vpop.f32.mrf.mxu1 }
 0x68d   : > { %v1967_v13 = vpop.f32.mrf.mxu1 }
 0x68f   : > { %v3416_v25 = vpop.f32.mrf.mxu1 }
 0x690   : > { %v3637_v25 = vld [vmem:[%s3915_s8 + $0x18] sm:$0xff]  }
 0x691   : > { %v1970_v14 = vpop.f32.mrf.mxu1  ;;  %3479 = vmatpush3.bf16.msra.mxu1 %v3637_v25 }
 0x692   : > { %3480 = vmatprep.subr.bf16.mxu1 %v3736_v6  ;;  %v3638_v14 = vld [vmem:[%s3915_s8 + $0x10] sm:$0xff]  }
 0x693   : > { %v3417_v15 = vpop.f32.mrf.mxu1 }
 0x694   : > { %v3639_v15 = vld [vmem:[%s3915_s8 + $0x8] sm:$0xff]  }
 0x695   : > { %v2093_v16 = vpop.f32.mrf.mxu1  ;;  %3481 = vmatpush3.bf16.msra.mxu1 %v3638_v14 }
 0x696   : > { %3482 = vmatprep.subr.bf16.mxu1 %v3736_v6 }
 0x697   : > { %v3428_v17 = vpop.f32.mrf.mxu1 }
 0x699   : > { %v2096_v19 = vpop.f32.mrf.mxu1  ;;  %3483 = vmatpush3.bf16.msra.mxu1 %v3639_v15 }
 0x69a   : > { %3484 = vmatprep.subr.bf16.mxu1 %v3736_v6 }
 0x69b   : > { %v3429_v20 = vpop.f32.mrf.mxu1 }
 0x6c1   : > { %v2204_v22 = vpop.f32.mrf.mxu1 }
 0x6c2   : > { %v3606_v24 = vpack.i.bf16 %v2204_v22, %v1747_v7 }
 0x6c3   : > { %v3440_v26 = vpop.f32.mrf.mxu1 }
 0x6c4   : > { %3607 = vrot.lane.b32.xlu1 %v3606_v24, %s3744_s3 }
 0x6c5   : > { %v2207_v30 = vpop.f32.mrf.mxu1 }
 0x6c7   : > { %v3441_v31 = vpop.f32.mrf.mxu1 }
 0x6c9   : > { %v2314_v32 = vpop.f32.mrf.mxu1 }
 0x6ca   : > { %v3611_v34 = vpack.i.bf16 %v2314_v32, %v1857_v11 }
 0x6cb   : > { %v3452_v35 = vpop.f32.mrf.mxu1 }
 0x6cc   : > { %3612 = vrot.lane.b32.xlu1 %v3611_v34, %s3742_s1 }
 0x6cd   : > { %v2317_v36 = vpop.f32.mrf.mxu1 }
 0x6cf   : > { %v3453_v37 = vpop.f32.mrf.mxu1 }
 0x6d1   : > { %v2424_v38 = vpop.f32.mrf.mxu1 }
 0x6d2   : > { %v3616_v39 = vpack.i.bf16 %v2424_v38, %v1967_v13  ;;  %v3641_v38 = vld [vmem:[%s3924_s9 + $0x38] sm:$0xff]  }
 0x6d3   : > { %v3464_v40 = vpop.f32.mrf.mxu1 }
 0x6d4   : > { %3617 = vrot.lane.b32.xlu1 %v3616_v39, %s3738_s0  ;;  %v3642_v39 = vld [vmem:[%s3924_s9 + $0x30] sm:$0xff]   ;;  %v3643_v40 = vld [vmem:[%s3924_s9 + $0x28] sm:$0xff]  }
 0x6d5   : > { %v2427_v41 = vpop.f32.mrf.mxu1 }
 0x6d6   : > { %v3644_v41 = vld [vmem:[%s3924_s9 + $0x20] sm:$0xff]  }
 0x6d7   : > { %v3465_v42 = vpop.f32.mrf.mxu1 }
 0x6d8   : > { %v3645_v42 = vld [vmem:[%s3924_s9 + $0x18] sm:$0xff]  }
 0x736   : > { %v3608_v43 = vpop.permute.xlu1 %3607 }
 0x737   : > { %v3610_v45 = vunpack.i.h.bf16 %v3608_v43  ;;  %v3609_v46 = vunpack.i.l.bf16 %v3608_v43  ;;  %v3646_v43 = vld [vmem:[%s3924_s9 + $0x10] sm:$0xff]  }
 0x739   : > { %v2442_v51 = vsel %vm1535_vm5, %v2093_v16, %v3610_v45  ;;  %v1985_v54 = vsel %vm1535_vm5, %v1636_v2, %v3609_v46  ;;  %v3640_v16 = vld [vmem:[%s3915_s8] sm:$0xff]   ;;  %s4491_s8 = scalar_lea.vmem %s4450_s11, %s3872_s26 }
 0x73a   : > { %3485 = vmatpush3.bf16.msra.mxu1 %v3640_v16  ;;  %v3214_v27 = vld [vmem:[%s4491_s8] ss:$0 sm:$0xff] }
 0x73b   : > { %v3648_v45 = vld [vmem:[%s3924_s9] sm:$0xff]  }
 0x73c   : > { %v3216_v46 = vld [vmem:[%s809_s28] ss:$0 sm:$0xff]  ;;  %s4492_s28 = sld [smem:[#allocation16_spill]] (!%p3231_p5) }
 0x73e   : > { %v3613_v44 = vpop.permute.xlu1 %3612 }
 0x73f   : > { %v3615_v47 = vunpack.i.h.bf16 %v3613_v44  ;;  %v3614_v48 = vunpack.i.l.bf16 %v3613_v44  ;;  %v3647_v44 = vld [vmem:[%s3924_s9 + $0x8] sm:$0xff]  }
 0x741   : > { %v2443_v52 = vsel %vm1986_vm9, %v2442_v51, %v3615_v47  ;;  %v1987_v53 = vsel %vm1986_vm9, %v1985_v54, %v3614_v48 }
 0x746   : > { %v3618_v50 = vpop.permute.xlu1 %3617 }
 0x747   : > { %v3620_v55 = vunpack.i.h.bf16 %v3618_v50  ;;  %v3619_v56 = vunpack.i.l.bf16 %v3618_v50 }
 0x749   : > { %v2444_v57 = vsel %vm1988_vm10, %v2443_v52, %v3620_v55  ;;  %v1989_v58 = vsel %vm1988_vm10, %v1987_v53, %v3619_v56 }
 0x74a   : > { %v2445_v59 = vpack.c.bf16 %v2444_v57, %v1989_v58 }
 0x74c   : > { %3475 = vmatmul.mubr.msk.bf16.vlgmr.msra.gmra.mxu0 %vm1375_vm3, %v2445_v59 }
 0x74d   : > { %3506 = vmatprep.mubr.msk.bf16.mxu0 %vm3737_vm4, %v3736_v6  ;;  %3491 = vmatpush3.bf16.msra.mxu0 %v3641_v38 }
 0x74e   : > { %3492 = vmatprep.subr.bf16.mxu0 %v3736_v6 }
 0x751   : > { %3493 = vmatpush3.bf16.msra.mxu0 %v3642_v39 }
 0x752   : > { %3494 = vmatprep.subr.bf16.mxu0 %v3736_v6 }
 0x755   : > { %3495 = vmatpush3.bf16.msra.mxu0 %v3643_v40 }
 0x756   : > { %3496 = vmatprep.subr.bf16.mxu0 %v3736_v6 }
 0x759   : > { %3497 = vmatpush3.bf16.msra.mxu0 %v3644_v41 }
 0x75a   : > { %3498 = vmatprep.subr.bf16.mxu0 %v3736_v6 }
 0x75d   : > { %3499 = vmatpush3.bf16.msra.mxu0 %v3645_v42 }
 0x75e   : > { %3500 = vmatprep.subr.bf16.mxu0 %v3736_v6 }
 0x761   : > { %3501 = vmatpush3.bf16.msra.mxu0 %v3646_v43 }
 0x762   : > { %3502 = vmatprep.subr.bf16.mxu0 %v3736_v6 }
 0x765   : > { %3503 = vmatpush3.bf16.msra.mxu0 %v3647_v44  ;;  %v3230_v44 = vld [vmem:[%s817_s23] ss:$0 sm:$0xff] }
 0x766   : > { %3504 = vmatprep.subr.bf16.mxu0 %v3736_v6 }
 0x769   : > { %3505 = vmatpush3.bf16.msra.mxu0 %v3648_v45 }
 0x80c   : > { %v2522_v61 = vpop.f32.mrf.mxu0 }
 0x80d   : > { %v2523_v62 = vadd.f32 %v3208_v60, %v2522_v61 }
 0x80e   : > { %v3476_v63 = vpop.f32.mrf.mxu0 }
 0x80f   : > { %v4329_v0 = vadd.f32 %v2523_v62, %v4102_v28 }
 0x810   : > { %v2525_v1 = vpop.f32.mrf.mxu0 }
 0x811   : > { %v2526_v2 = vadd.f32 %v3208_v60, %v2525_v1  ;;  %v2533_v3 = vsel %vm1375_vm3, %v4329_v0, 0.0 }
 0x812   : > { %2534 = vadd.xlane.f32.xlu1 %v2533_v3  ;;  %v3477_v4 = vpop.f32.mrf.mxu0 }
 0x813   : > { %v4334_v5 = vadd.f32 %v2526_v2, %v4104_v29 }
 0x815   : > { %v2536_v7 = vsel %vm1375_vm3, %v4334_v5, 0.0 }
 0x816   : > { %2537 = vadd.xlane.f32.xlu0 %v2536_v7 }
 0x89b   : > { %v2535_v8 = vpop.xlane.xlu1 %2534 }
 0x89c   : > { %v2539_v9 = vmul.f32 0.015625, %v2535_v8 }
 0x89e   : > { %v2541_v28 = vsub.f32 %v4329_v0, %v2539_v9 }
 0x89f   : > { %v2538_v10 = vpop.xlane.xlu0 %2537 }
 0x8a0   : > { %v2540_v11 = vmul.f32 0.015625, %v2538_v10  ;;  %v2543_v18 = vmul.f32 %v2541_v28, %v2541_v28 }
 0x8a2   : > { %v2542_v49 = vsub.f32 %v4334_v5, %v2540_v11  ;;  %v2545_v12 = vsel %vm1375_vm3, %v2543_v18, 0.0 }
 0x8a3   : > { %2546 = vadd.xlane.f32.xlu0 %v2545_v12 }
 0x8a4   : > { %v2544_v29 = vmul.f32 %v2542_v49, %v2542_v49 }
 0x8a6   : > { %v2548_v13 = vsel %vm1375_vm3, %v2544_v29, 0.0 }
 0x8a7   : > { %2549 = vadd.xlane.f32.xlu0 %v2548_v13 }
 0x92c   : > { %v2547_v17 = vpop.xlane.xlu0 %2546 }
 0x92d   : > { %v2551_v19 = vmul.f32 0.015625, %v2547_v17 }
 0x92f   : > { %v2553_v20 = vadd.f32 1e-06, %v2551_v19 }
 0x930   : > { %v2550_v21 = vpop.xlane.xlu0 %2549 }
 0x931   : > { %3685 = vrsqrt.f32 %v2553_v20  ;;  %v2552_v22 = vmul.f32 0.015625, %v2550_v21 }
 0x933   : > { %v2554_v23 = vadd.f32 1e-06, %v2552_v22 }
 0x935   : > { %3687 = vrsqrt.f32 %v2554_v23 }
 0x93e   : > { %v3686_v24 = vpop.eup %3685 }
 0x93f   : > { %v2557_v26 = vmul.f32 %v3686_v24, %v2541_v28 }
 0x941   : > { %v2565_v32 = vmul.f32 %v3214_v27, %v2557_v26 }
 0x942   : > { %v3688_v30 = vpop.eup %3687 }
 0x943   : > { %v2558_v31 = vmul.f32 %v3688_v30, %v2542_v49  ;;  %v2573_v35 = vadd.f32 %v3215_v33, %v2565_v32 }
 0x945   : > { %v2566_v34 = vmul.f32 %v3214_v27, %v2558_v31  ;;  %v3746_v27 = vmov -1.0  }
 0x947   : > { %v2574_v36 = vadd.f32 %v3215_v33, %v2566_v34 }
 0x949   : > { %v2575_v37 = vpack.c.bf16 %v2574_v36, %v2573_v35 }
 0x94b   : > { %3487 = vmatmul.mubr.msk.bf16.vlgmr.msra.gmra.mxu1 %vm1375_vm3, %v2575_v37 }
 0xa0b   : > { %v2652_v47 = vpop.f32.mrf.mxu1 }
 0xa0c   : > { %v2653_v48 = vadd.f32 %v3216_v46, %v2652_v47 }
 0xa0d   : > { %v3488_v50 = vpop.f32.mrf.mxu1 }
 0xa0e   : > { %v2661_v51 = vmul.f32 0.70710677, %v2653_v48  ;;  %v2659_v37 = vmul.f32 0.5, %v2653_v48 }
 0xa0f   : > { %v2655_v54 = vpop.f32.mrf.mxu1 }
 0xa10   : > { %v2667_v55 = vand.u32 2147483647, %v2661_v51  ;;  %v2656_v56 = vadd.f32 %v3216_v46, %v2655_v54  ;;  %vm2663_vm11 = vcmp.ge.f32.partialorder %v2661_v51, 0.0 }
 0xa11   : > { %v3489_v52 = vpop.f32.mrf.mxu1  ;;  %v2665_v30 = vsel %vm2663_vm11, 1.0, %v3746_v27 }
 0xa12   : > { %v2669_v53 = vmul.f32 0.3275911, %v2667_v55  ;;  %v2662_v57 = vmul.f32 0.70710677, %v2656_v56  ;;  %v2695_v61 = vsub.f32 0.0, %v2667_v55  ;;  %v2660_v38 = vmul.f32 0.5, %v2656_v56 }
 0xa14   : > { %v2671_v58 = vadd.f32 1.0, %v2669_v53  ;;  %v2668_v59 = vand.u32 2147483647, %v2662_v57  ;;  %v2697_v62 = vmul.f32 %v2695_v61, %v2667_v55  ;;  %vm2664_vm12 = vcmp.ge.f32.partialorder %v2662_v57, 0.0 }
 0xa15   : > { %v2666_v34 = vsel %vm2664_vm12, 1.0, %v3746_v27 }
 0xa16   : > { %3689 = vrcp.f32 %v2671_v58  ;;  %v2670_v6 = vmul.f32 0.3275911, %v2668_v59  ;;  %v2696_v63 = vsub.f32 0.0, %v2668_v59  ;;  %v2699_v3 = vmul.f32 1.442695, %v2697_v62 }
 0xa18   : > { %v2672_v60 = vadd.f32 1.0, %v2670_v6  ;;  %v2698_v4 = vmul.f32 %v2696_v63, %v2668_v59 }
 0xa1a   : > { %3691 = vrcp.f32 %v2672_v60  ;;  %v2701_v10 = vmul.f32 1.442695, %v2698_v4 }
 0xa1b   : > { %3693 = vpow2.f32 %v2699_v3 }
 0xa1c   : > { %3695 = vpow2.f32 %v2701_v10 }
 0xa23   : > { %v3690_v1 = vpop.eup %3689 }
 0xa24   : > { %v2677_v2 = vmul.f32 1.0614054, %v3690_v1 }
 0xa26   : > { %v2679_v7 = vadd.f32 -1.4531521, %v2677_v2 }
 0xa27   : > { %v3692_v8 = vpop.eup %3691 }
 0xa28   : > { %v2681_v9 = vmul.f32 %v3690_v1, %v2679_v7  ;;  %v2678_v28 = vmul.f32 1.0614054, %v3692_v8  ;;  %v3694_v20 = vpop.eup %3693 }
 0xa29   : > { %v3696_v26 = vpop.eup %3695 }
 0xa2a   : > { %v2683_v11 = vadd.f32 1.4214138, %v2681_v9  ;;  %v2680_v18 = vadd.f32 -1.4531521, %v2678_v28 }
 0xa2c   : > { %v2685_v49 = vmul.f32 %v3690_v1, %v2683_v11  ;;  %v2682_v12 = vmul.f32 %v3692_v8, %v2680_v18 }
 0xa2e   : > { %v2687_v29 = vadd.f32 -0.28449672, %v2685_v49  ;;  %v2684_v13 = vadd.f32 1.4214138, %v2682_v12 }
 0xa30   : > { %v2689_v25 = vmul.f32 %v3690_v1, %v2687_v29  ;;  %v2686_v14 = vmul.f32 %v3692_v8, %v2684_v13 }
 0xa32   : > { %v2691_v15 = vadd.f32 0.2548296, %v2689_v25  ;;  %v2688_v16 = vadd.f32 -0.28449672, %v2686_v14 }
 0xa34   : > { %v2693_v17 = vmul.f32 %v3690_v1, %v2691_v15  ;;  %v2690_v19 = vmul.f32 %v3692_v8, %v2688_v16 }
 0xa36   : > { %v2703_v21 = vmul.f32 %v3694_v20, %v2693_v17  ;;  %v2692_v22 = vadd.f32 0.2548296, %v2690_v19 }
 0xa38   : > { %v2705_v23 = vsub.f32 1.0, %v2703_v21  ;;  %v2694_v24 = vmul.f32 %v3692_v8, %v2692_v22 }
 0xa3a   : > { %v2707_v31 = vmul.f32 %v2705_v23, %v2665_v30  ;;  %v2704_v32 = vmul.f32 %v3696_v26, %v2694_v24 }
 0xa3c   : > { %v2706_v33 = vsub.f32 1.0, %v2704_v32  ;;  %v2709_v35 = vadd.f32 1.0, %v2707_v31 }
 0xa3e   : > { %v2708_v36 = vmul.f32 %v2706_v33, %v2666_v34  ;;  %v2711_v40 = vmul.f32 %v2709_v35, %v2659_v37 }
 0xa40   : > { %v2710_v39 = vadd.f32 1.0, %v2708_v36 }
 0xa42   : > { %v2712_v41 = vmul.f32 %v2710_v39, %v2660_v38 }
 0xa44   : > { %v2713_v42 = vpack.c.bf16 %v2712_v41, %v2711_v40 }
 0xa46   : > { %3507 = vmatmul.mubr.bf16.vlgmr.msra.gmra.mxu0 %v2713_v42 }
 0xb06   : > { %v2812_v43 = vpop.f32.mrf.mxu0 }
 0xb07   : > { %v2819_v45 = vadd.f32 %v2812_v43, %v4329_v0 }
 0xb08   : > { %v3508_v46 = vpop.f32.mrf.mxu0 }
 0xb09   : > { %v2828_v47 = vadd.f32 %v3230_v44, %v2819_v45 }
 0xb0a   : > { %v2815_v50 = vpop.f32.mrf.mxu0 }
 0xb0b   : > { %2830 = vst.msk [vmem:[#allocation2] sm:$0xff] %vm1375_vm3, %v2828_v47  ;;  %v2820_v48 = vadd.f32 %v2815_v50, %v4334_v5  ;;  %2835 = sbr.rel (%p3231_p5) target bundleno = 3339 (0xd0b), region = 112 }
 0xb0c   : > { %v3509_v51 = vpop.f32.mrf.mxu0 }
 0xb0d   : > { %v2829_v54 = vadd.f32 %v3230_v44, %v2820_v48 }
 0xb0f   : > { %2831 = vst.msk [vmem:[#allocation2 + $0x8] sm:$0xff] %vm1375_vm3, %v2829_v54 }
 0xb10   : > { %v2837_v55 = vrot.slane %v2829_v54, 7  ;;  %vm2839_vm13 = vcmask 1040384   ;;  %vm2843_vm14 = vcmask 517120   ;;  %v2878_v5 = vld [vmem:[%s4458_s19 + $0x38] sm:$0xff]  ;;  %v3747_v6 = vmov 0.0   ;;  %v2877_v60 = vld [vmem:[%s4458_s19 + $0x30] sm:$0xff] }
 0xb11   : > { %3510 = vmatprep.subr.mxu0 %v3747_v6  ;;  %vm3748_vm15 = vmmov 0   ;;  %v2876_v61 = vld [vmem:[%s4458_s19 + $0x28] sm:$0xff]  ;;  %v2875_v62 = vld [vmem:[%s4458_s19 + $0x20] sm:$0xff]  ;;  %v2874_v63 = vld [vmem:[%s4458_s19 + $0x18] sm:$0xff]  ;;  %vm2959_vm0 = vcmask 74752  }
 0xb12   : > { %v2840_v56 = vsel %vm2839_vm13, %v2828_v47, %v2837_v55  ;;  %3526 = vmatprep.mubr.msk.f32.mxu0 %vm3748_vm15, %v3747_v6  ;;  %3511 = vmatpush3.msra.mxu0 %v2878_v5  ;;  %v2873_v1 = vld [vmem:[%s4458_s19 + $0x10] sm:$0xff]  ;;  %v2872_v2 = vld [vmem:[%s4458_s19 + $0x8] sm:$0xff]  ;;  %v2871_v3 = vld [vmem:[%s4458_s19] sm:$0xff] }
 0xb13   : > { %v2844_v52 = vsel %vm2843_vm14, %v2840_v56, 0.0  ;;  %3512 = vmatprep.subr.mxu0 %v3747_v6  ;;  %v3232_v28 = vld [vmem:[%s4492_s28] ss:$0 sm:$0xff] }
 0xb14   : > { %2845 = vadd.xlane.f32.xlu0 %v2844_v52  ;;  %3513 = vmatpush3.msra.mxu0 %v2877_v60  ;;  %v3233_v11 = vld [vmem:[%s4493_s7] ss:$0 sm:$0xff] }
 0xb15   : > { %3514 = vmatprep.subr.mxu0 %v3747_v6  ;;  %v3234_v12 = vld [vmem:[%s4494_s22] ss:$0 sm:$0xff] }
 0xb16   : > { %3515 = vmatpush3.msra.mxu0 %v2876_v61 }
 0xb17   : > { %3516 = vmatprep.subr.mxu0 %v3747_v6 }
 0xb18   : > { %3517 = vmatpush3.msra.mxu0 %v2875_v62 }
 0xb19   : > { %3518 = vmatprep.subr.mxu0 %v3747_v6 }
 0xb1a   : > { %3519 = vmatpush3.msra.mxu0 %v2874_v63 }
 0xb1b   : > { %3520 = vmatprep.subr.mxu0 %v3747_v6 }
 0xb1c   : > { %3521 = vmatpush3.msra.mxu0 %v2873_v1 }
 0xb1d   : > { %3522 = vmatprep.subr.mxu0 %v3747_v6 }
 0xb1e   : > { %3523 = vmatpush3.msra.mxu0 %v2872_v2 }
 0xb1f   : > { %3524 = vmatprep.subr.mxu0 %v3747_v6 }
 0xb20   : > { %3525 = vmatpush3.msra.mxu0 %v2871_v3 }
 0xb9d   : > { %v2846_v0 = vpop.xlane.xlu0 %2845 }
 0xb9e   : > { %v2847_v53 = vmul.f32 0.015625, %v2846_v0 }
 0xba0   : > { %v2848_v57 = vsub.f32 %v2840_v56, %v2847_v53 }
 0xba2   : > { %v2849_v58 = vmul.f32 %v2848_v57, %v2848_v57 }
 0xba4   : > { %v2850_v59 = vsel %vm2843_vm14, %v2849_v58, 0.0 }
 0xba5   : > { %2851 = vadd.xlane.f32.xlu0 %v2850_v59 }
 0xc2e   : > { %v2852_v4 = vpop.xlane.xlu0 %2851 }
 0xc2f   : > { %v2853_v7 = vmul.f32 0.015625, %v2852_v4 }
 0xc31   : > { %v2854_v8 = vadd.f32 1e-06, %v2853_v7 }
 0xc33   : > { %3697 = vrsqrt.f32 %v2854_v8 }
 0xc40   : > { %v3698_v9 = vpop.eup %3697 }
 0xc41   : > { %v2856_v10 = vmul.f32 %v3698_v9, %v2848_v57 }
 0xc43   : > { %v2863_v18 = vmul.f32 %v3232_v28, %v2856_v10 }
 0xc45   : > { %v2870_v49 = vadd.f32 %v3233_v11, %v2863_v18 }
 0xc47   : > { %3527 = vmatmul.mubr.msk.f32.vlgmr.msra.gmra.mxu0 %vm1375_vm3, %v2870_v49 }
 0xd07   : > { %v2955_v29 = vpop.f32.mrf.mxu0 }
 0xd08   : > { %v2956_v13 = vadd.f32 %v3234_v12, %v2955_v29 }
 0xd09   : > { %v3528_v25 = vpop.f32.mrf.mxu0 }
 0xd0a   : > { %2960 = vst.msk [vmem:[#allocation3] sm:$0x3] %vm2959_vm0, %v2956_v13 }
 0xd0b PF: > { %p3533_p6 = scmp.eq.s32.totalorder %s3866_s25, 1  ;;  %s3749_s3 = smov [#allocation3]  }
 0xd0c   : > { %s2968_s4 = sshll.u32 %s3749_s3, 4  ;;  %s2969_s4 = int_to_ptr.vmem [resolvable:$true] %s2968_s4 }
 0xd0d   : > { %s3699_s18 = scalar_lea.vmem %s2969_s4, 32  ;;  %p3706_p10 = scmp.lt.s32.totalorder %s2969_s4, %s2969_s4 }
 0xd0e   : > { %p3700_p7 = scmp.ne.s32.totalorder %s2969_s4, %s3699_s18  ;;  %p3707_p11 = scmp.lt.s32.totalorder %s3699_s18, %s3699_s18 }
 0xd10   : > { %p3701_p8 = pnand %p3700_p7, %p3533_p6  ;;  %p3708_p12 = por %p3707_p11, %p3706_p10 }
 0xd12   : > { %p3702_p9 = pneg %p3701_p8 }
 0xd14   : > { %p3709_p13 = pnand %p3708_p12, %p3702_p9 }
 0xd16   : > { %3712 = shalt.err (!%p3709_p13)
}
 0xd17   : > { %s4495_s5 = sld [smem:[#allocation19_spill]] }
 0xd1d   : > { %3530 = dma.vmem_to_hbm [thread:$0]  (%p3533_p6), %s2969_s4, 32, %s4495_s5, [#allocation4]  }
 0xd1e   : > { %3728 = dma.done.wait (%p3533_p6), [#allocation4], 32  }
 0xd1f   : > { %3730 = vsyncadd (%p3533_p6), [#allocation4], 4294967264 }
 0xd20 PF: > { %s4496_s8 = sld [smem:[#allocation6_spill]] }
 0xd26   : > { %s32_s2 = sadd.s32 1, %s4496_s8  }
 0xd27   : > { %p29_p0 = scmp.ge.s32.totalorder %s32_s2, 4  }
 0xd29   :  { %31 = sbr.rel (!%p29_p0) target bundleno = 15 (0xf), region = 172 }
 0xd2e   :  { %2981 = vsyncpa [#allocation4], 1 }
 0xd2f   :  { %2983 = vsyncpa [#allocation4 + $0x1], 1 }

</bundles_post_ra>
